<compile_context>
chip_gen: v5e
topology: v5e:2x2
jax: 0.10.0
libtpu: 0.0.40
codegen_flags: <defaults>
</compile_context>

<pallas_src>
import jax
import jax.numpy as jnp
from jax import lax
from jax.experimental import pallas as pl
from jax.experimental.pallas import tpu as pltpu

EPS = 1e-8
LRELU_SLOPE = 0.2

try:
    _VMEM_PHYS = int(getattr(pltpu.get_tpu_info(), "vmem_capacity_bytes",
                             64 * 1024 * 1024))
except Exception:  # pragma: no cover - conservative fallback off-TPU
    _VMEM_PHYS = 64 * 1024 * 1024
VMEM_LIMIT = max(32 * 1024 * 1024, min(100 * 1024 * 1024, int(_VMEM_PHYS * 0.75)))
_TILE_BUDGET = int(VMEM_LIMIT * 0.6)


def feat_size(blocks):
    return min(int(8192 / 2 ** blocks), 512)


def _padlane(c):
    return max(128, ((c + 127) // 128) * 128)


def _pad8(n):
    return ((n + 7) // 8) * 8


def _pick_rows(H, W, Cin, Cout, upsample):
    """Largest power-of-two input-row tile whose VMEM footprint fits the budget."""
    mult = 2 if upsample else 1
    halo = 1 if upsample else 2
    th = H
    while th > 8:
        oh, ow = mult * th, mult * W
        slab_b = _pad8(th + halo) * _pad8(W + halo) * _padlane(Cin) * 2
        est = (2 * slab_b                              # double-buffered bf16 slab
               + 2 * slab_b                            # f32 affine intermediate
               + 2 * oh * ow * _padlane(Cout) * 2      # t out tiles (bf16, 2 buffers)
               + 2 * oh * ow * _padlane(Cout) * 2      # noise-term tiles (bf16)
               + 2 * oh * ow * _padlane(Cout) * 4      # f32 conv/epilogue intermediates
               + 2 * 9 * _pad8(Cin) * _padlane(Cout) * 2
               + (1 << 20))
        if est <= _TILE_BUDGET:
            return th
        th //= 2
    return 8


def _pick_rows_fadein(H, W, C):
    th = H
    while th > 16:
        est = (2 * th * W * _padlane(C) * 2
               + 2 * th * W * _padlane(3) * 4
               + 2 * (th // 2) * (W // 2) * _padlane(3) * 4
               + 4 * th * W * _padlane(3) * 4
               + (1 << 20))
        if est <= _TILE_BUDGET:
            return th
        th //= 2
    return 16


# ---------------------------------------------------------------------------
# Shared fused epilogue: conv bias + noise -> LeakyReLU -> normalize() + spatial sums
# ---------------------------------------------------------------------------
def _fused_epilogue(acc, nz_ref, b_ref, rt, t_ref, sum_ref):
    rows, cols, cout = nz_ref.shape
    y = acc + b_ref[...]                                          # conv bias
    y = y + nz_ref[...].reshape(rows * cols, cout).astype(jnp.float32)   # apply_noise
    y = jnp.where(y >= 0, y, LRELU_SLOPE * y)                     # LeakyReLU(0.2)
    cm = jnp.mean(y, axis=1, keepdims=True)                       # channel mean (dim=1)
    t = y * lax.rsqrt(cm + EPS)                                   # normalize()
    t_ref[0] = t.reshape(rows, cols, cout).astype(t_ref.dtype)

    @pl.when(rt == 0)
    def _():
        sum_ref[...] = jnp.zeros_like(sum_ref)

    sum_ref[...] += jnp.sum(t, axis=0, keepdims=True)[None]


# ---------------------------------------------------------------------------
# Pallas kernels
# ---------------------------------------------------------------------------
def _conv3x3_passA_kernel(x_hbm, a_ref, c_ref, w_ref, b_ref, nz_ref,
                          t_ref, sum_ref, slab, sem):
    """3x3 SAME conv with in-kernel halo, fused prev-AdaIN affine and epilogue.

      x_hbm : (B, H, W, Cin) bf16 in HBM (manual, double-buffered halo DMA)
      a_ref/c_ref : (1, 1, Cin) f32 per-batch affine of the previous AdaIN
      w_ref : (3, 3, Cin, Cout) bf16    b_ref: (1, Cout) f32    nz_ref: (TH, W, Cout) bf16
      t_ref : (1, TH, W, Cout) bf16     sum_ref: (1, 1, Cout) f32 (revisited over rt)
      slab  : (2, TH+2, W+2, Cin) bf16  sem: DMA (2, 3)
    """
    bi = pl.program_id(0)
    rt = pl.program_id(1)
    n_rt = pl.num_programs(1)
    _, TH, W, Cout = t_ref.shape
    _, Hs, Ws, Cin = slab.shape
    H = x_hbm.shape[1]
    slot = rt % 2
    nslot = (rt + 1) % 2

    def copies(rt_t, sl):
        row0 = pl.multiple_of(rt_t * TH, TH)
        return (
            pltpu.make_async_copy(                       # main TH rows
                x_hbm.at[bi, pl.ds(row0, TH), :, :],
                slab.at[sl, pl.ds(1, TH), pl.ds(1, W), :], sem.at[sl, 0]),
            pltpu.make_async_copy(                       # top halo row (clamped dup)
                x_hbm.at[bi, pl.ds(jnp.maximum(row0 - 1, 0), 1), :, :],
                slab.at[sl, pl.ds(0, 1), pl.ds(1, W), :], sem.at[sl, 1]),
            pltpu.make_async_copy(                       # bottom halo row (clamped dup)
                x_hbm.at[bi, pl.ds(jnp.minimum(row0 + TH, H - 1), 1), :, :],
                slab.at[sl, pl.ds(TH + 1, 1), pl.ds(1, W), :], sem.at[sl, 2]),
        )

    @pl.when(rt == 0)
    def _():                                             # prime the first tile of a batch
        for cp in copies(rt, slot):
            cp.start()

    @pl.when(rt + 1 < n_rt)
    def _():                                             # prefetch the next row tile
        for cp in copies(rt + 1, nslot):
            cp.start()

    for cp in copies(rt, slot):
        cp.wait()

    # Fused "pass B" of the previous conv: per-(batch, channel) affine on the slab, then
    # re-zero the conv's zero-padding border (cols always, rows at the image boundary).
    slab[slot] = (slab[slot].astype(jnp.float32) * a_ref[...]
                  + c_ref[...]).astype(slab.dtype)
    zc = jnp.zeros((Hs, 1, Cin), slab.dtype)
    slab[slot, pl.ds(0, Hs), pl.ds(0, 1), :] = zc
    slab[slot, pl.ds(0, Hs), pl.ds(W + 1, 1), :] = zc
    zr = jnp.zeros((1, Ws, Cin), slab.dtype)

    @pl.when(rt == 0)
    def _():
        slab[slot, pl.ds(0, 1), pl.ds(0, Ws), :] = zr

    @pl.when(rt == n_rt - 1)
    def _():
        slab[slot, pl.ds(Hs - 1, 1), pl.ds(0, Ws), :] = zr

    acc = jnp.zeros((TH * W, Cout), jnp.float32)
    for dy in range(3):
        for dx in range(3):
            patch = slab[slot, pl.ds(dy, TH), pl.ds(dx, W), :].reshape(TH * W, Cin)
            acc = acc + jnp.dot(patch, w_ref[dy, dx],
                                preferred_element_type=jnp.float32)

    _fused_epilogue(acc, nz_ref, b_ref, rt, t_ref, sum_ref)


def _deconv_passA_kernel(x_hbm, a_ref, c_ref, w_ref, b_ref, nz_ref,
                         t_ref, sum_ref, slab, sem):
    """ConvTranspose2d(k=3,s=2,p=1,op=1) as a 4-phase sub-pixel conv, fused epilogue.

      x_hbm : (B, Hin, Win, Cin) bf16 in HBM        a/c: (1, 1, Cin) f32 prev-AdaIN affine
      w_ref : (3, 3, Cin, Cout) bf16 (plain (kh,kw,Cin,Cout) transpose of torch weight)
      t_ref : (1, 2*THi, 2*Win, Cout) bf16          slab: (2, THi+1, Win+1, Cin) bf16
    """
    bi = pl.program_id(0)
    rt = pl.program_id(1)
    n_rt = pl.num_programs(1)
    _, THo, Wo, Cout = t_ref.shape
    THi, Win = THo // 2, Wo // 2
    _, Hs, Ws, Cin = slab.shape
    Hin = x_hbm.shape[1]
    slot = rt % 2
    nslot = (rt + 1) % 2

    def copies(rt_t, sl):
        row0 = pl.multiple_of(rt_t * THi, THi)
        return (
            pltpu.make_async_copy(                       # main THi rows
                x_hbm.at[bi, pl.ds(row0, THi), :, :],
                slab.at[sl, pl.ds(0, THi), pl.ds(0, Win), :], sem.at[sl, 0]),
            pltpu.make_async_copy(                       # bottom halo row (clamped dup)
                x_hbm.at[bi, pl.ds(jnp.minimum(row0 + THi, Hin - 1), 1), :, :],
                slab.at[sl, pl.ds(THi, 1), pl.ds(0, Win), :], sem.at[sl, 1]),
        )

    @pl.when(rt == 0)
    def _():
        for cp in copies(rt, slot):
            cp.start()

    @pl.when(rt + 1 < n_rt)
    def _():
        for cp in copies(rt + 1, nslot):
            cp.start()

    for cp in copies(rt, slot):
        cp.wait()

    # Fused previous AdaIN affine; zero the (non-existent) right/bottom neighbors.
    slab[slot] = (slab[slot].astype(jnp.float32) * a_ref[...]
                  + c_ref[...]).astype(slab.dtype)
    slab[slot, pl.ds(0, Hs), pl.ds(Win, 1), :] = jnp.zeros((Hs, 1, Cin), slab.dtype)

    @pl.when(rt == n_rt - 1)
    def _():
        slab[slot, pl.ds(THi, 1), pl.ds(0, Ws), :] = jnp.zeros((1, Ws, Cin), slab.dtype)

    def patch(dy, dx):
        return slab[slot, pl.ds(dy, THi), pl.ds(dx, Win), :].reshape(THi * Win, Cin)

    def mm(p, kh, kw):
        return jnp.dot(p, w_ref[kh, kw], preferred_element_type=jnp.float32)

    base = patch(0, 0)
    right = patch(0, 1)
    down = patch(1, 0)
    dright = patch(1, 1)
    # out[2a  ,2b  ] , out[2a  ,2b+1] , out[2a+1,2b  ] , out[2a+1,2b+1]
    p00 = mm(base, 1, 1)
    p01 = mm(base, 1, 2) + mm(right, 1, 0)
    p10 = mm(base, 2, 1) + mm(down, 0, 1)
    p11 = mm(base, 2, 2) + mm(right, 2, 0) + mm(down, 0, 2) + mm(dright, 0, 0)

    def r3(p):
        return p.reshape(THi, Win, Cout)

    row_e = jnp.stack([r3(p00), r3(p01)], axis=2).reshape(THi, Wo, Cout)
    row_o = jnp.stack([r3(p10), r3(p11)], axis=2).reshape(THi, Wo, Cout)
    y = jnp.stack([row_e, row_o], axis=1).reshape(THo, Wo, Cout)

    _fused_epilogue(y.reshape(THo * Wo, Cout), nz_ref, b_ref, rt, t_ref, sum_ref)


def _const_epilogue_kernel(x_ref, nz_ref, sc_ref, sb_ref, o_ref):
    # block3 const path: noise -> LeakyReLU -> normalize -> instance_norm -> style_mod.
    y = x_ref[0] + nz_ref[...].astype(jnp.float32)
    y = jnp.where(y >= 0, y, LRELU_SLOPE * y)
    cm = jnp.mean(y, axis=1, keepdims=True)
    y = y * lax.rsqrt(cm + EPS)
    sm = jnp.mean(y, axis=0, keepdims=True)
    y = (y - sm) * lax.rsqrt(sm + EPS)
    y = y * (sc_ref[0] + 1.0) + sb_ref[0]
    o_ref[0] = y.astype(o_ref.dtype)


def _style_kernel(x_ref, w_ref, b_ref, o_ref):
    # both AdaIN Linears of a block in one call (grid axis selects which AdaIN).
    o_ref[0] = (jnp.dot(x_ref[0], w_ref[0], preferred_element_type=jnp.float32)
                + b_ref[0])


def _rgb_kernel(x_ref, w_ref, b_ref, o_ref):
    # 1x1 torgb conv with the block's AdaIN affine folded into per-batch weights.
    o_ref[0] = (jnp.dot(x_ref[0], w_ref[0], preferred_element_type=jnp.float32)
                + b_ref[0])


def _fadein_kernel(alpha_ref, x_ref, low_ref, w_ref, b_ref, o_ref):
    # torgb (per-batch folded weights) + FadeIN blend, 2x nearest upsample of the
    # previous image folded in-kernel (both directions).
    _, TH, W, C = x_ref.shape
    alpha = alpha_ref[0]
    rgb = (jnp.dot(x_ref[0].reshape(TH * W, C), w_ref[0],
                   preferred_element_type=jnp.float32) + b_ref[0])
    rgb = rgb.reshape(TH, W, 3)
    low = low_ref[0]                                       # (TH//2, W//2, 3)
    up = jnp.broadcast_to(low[:, :, None, :], (TH // 2, W // 2, 2, 3)
                          ).reshape(TH // 2, W, 3)
    up = jnp.broadcast_to(up[:, None, :, :], (TH // 2, 2, W, 3)).reshape(TH, W, 3)
    o_ref[0] = alpha * (rgb - up) + up
    # TODO(synk): pack the output lane-dense as (TH, W*3) to avoid 3-lane masked stores.


# ---------------------------------------------------------------------------
# pallas_call wrappers
# ---------------------------------------------------------------------------
def conv3x3_passA(x, a, c, w, b, nz):
    B, H, W, Cin = x.shape
    Cout = w.shape[-1]
    TH = _pick_rows(H, W, Cin, Cout, upsample=False)
    n_rt = H // TH
    t, sums = pl.pallas_call(
        _conv3x3_passA_kernel,
        grid=(B, n_rt),
        in_specs=[
            pl.BlockSpec(memory_space=pl.ANY),                             # x (HBM)
            pl.BlockSpec((1, 1, Cin), lambda b_, r: (b_, 0, 0)),           # a
            pl.BlockSpec((1, 1, Cin), lambda b_, r: (b_, 0, 0)),           # c
            pl.BlockSpec((3, 3, Cin, Cout), lambda b_, r: (0, 0, 0, 0)),   # weight
            pl.BlockSpec((1, Cout), lambda b_, r: (0, 0)),                 # bias
            pl.BlockSpec((TH, W, Cout), lambda b_, r: (r, 0, 0)),          # noise term
        ],
        out_specs=(
            pl.BlockSpec((1, TH, W, Cout), lambda b_, r: (b_, r, 0, 0)),
            pl.BlockSpec((1, 1, Cout), lambda b_, r: (b_, 0, 0)),
        ),
        out_shape=(
            jax.ShapeDtypeStruct((B, H, W, Cout), jnp.bfloat16),
            jax.ShapeDtypeStruct((B, 1, Cout), jnp.float32),
        ),
        scratch_shapes=[
            pltpu.VMEM((2, TH + 2, W + 2, Cin), jnp.bfloat16),
            pltpu.SemaphoreType.DMA((2, 3)),
        ],
        compiler_params=pltpu.CompilerParams(
            dimension_semantics=("parallel", "arbitrary"),
            vmem_limit_bytes=VMEM_LIMIT),
    )(x, a, c, w, b.reshape(1, Cout), nz)
    return t, sums.reshape(B, Cout)


def deconv_passA(x, a, c, w, b, nz):
    B, Hin, Win, Cin = x.shape
    Cout = w.shape[-1]
    THi = _pick_rows(Hin, Win, Cin, Cout, upsample=True)
    n_rt = Hin // THi
    Hout, Wout = 2 * Hin, 2 * Win
    t, sums = pl.pallas_call(
        _deconv_passA_kernel,
        grid=(B, n_rt),
        in_specs=[
            pl.BlockSpec(memory_space=pl.ANY),
            pl.BlockSpec((1, 1, Cin), lambda b_, r: (b_, 0, 0)),
            pl.BlockSpec((1, 1, Cin), lambda b_, r: (b_, 0, 0)),
            pl.BlockSpec((3, 3, Cin, Cout), lambda b_, r: (0, 0, 0, 0)),
            pl.BlockSpec((1, Cout), lambda b_, r: (0, 0)),
            pl.BlockSpec((2 * THi, Wout, Cout), lambda b_, r: (r, 0, 0)),
        ],
        out_specs=(
            pl.BlockSpec((1, 2 * THi, Wout, Cout), lambda b_, r: (b_, r, 0, 0)),
            pl.BlockSpec((1, 1, Cout), lambda b_, r: (b_, 0, 0)),
        ),
        out_shape=(
            jax.ShapeDtypeStruct((B, Hout, Wout, Cout), jnp.bfloat16),
            jax.ShapeDtypeStruct((B, 1, Cout), jnp.float32),
        ),
        scratch_shapes=[
            pltpu.VMEM((2, THi + 1, Win + 1, Cin), jnp.bfloat16),
            pltpu.SemaphoreType.DMA((2, 2)),
        ],
        compiler_params=pltpu.CompilerParams(
            dimension_semantics=("parallel", "arbitrary"),
            vmem_limit_bytes=VMEM_LIMIT),
    )(x, a, c, w, b.reshape(1, Cout), nz)
    return t, sums.reshape(B, Cout)


def const_epilogue(x, nz, sc, sb):
    B, H, W, C = x.shape
    HW = H * W
    out = pl.pallas_call(
        _const_epilogue_kernel,
        grid=(B,),
        in_specs=[
            pl.BlockSpec((1, HW, C), lambda i: (i, 0, 0)),
            pl.BlockSpec((HW, C), lambda i: (0, 0)),
            pl.BlockSpec((1, 1, C), lambda i: (i, 0, 0)),
            pl.BlockSpec((1, 1, C), lambda i: (i, 0, 0)),
        ],
        out_specs=pl.BlockSpec((1, HW, C), lambda i: (i, 0, 0)),
        out_shape=jax.ShapeDtypeStruct((B, HW, C), jnp.bfloat16),
        compiler_params=pltpu.CompilerParams(
            dimension_semantics=("parallel",), vmem_limit_bytes=VMEM_LIMIT),
    )(x.reshape(B, HW, C), nz.reshape(HW, C),
      sc.reshape(B, 1, C), sb.reshape(B, 1, C))
    return out.reshape(B, H, W, C)


def style_linears(w_pair, adain_w, adain_b):
    """Both AdaIN Linears of a block in a single pallas_call.  Returns (2, B, 2*F)."""
    B = w_pair.shape[0]
    F2 = adain_w.shape[-1]
    x = jnp.transpose(w_pair, (1, 0, 2))               # (2, B, 512)
    return pl.pallas_call(
        _style_kernel,
        grid=(2,),
        in_specs=[
            pl.BlockSpec((1, B, 512), lambda i: (i, 0, 0)),
            pl.BlockSpec((1, 512, F2), lambda i: (i, 0, 0)),
            pl.BlockSpec((1, 1, F2), lambda i: (i, 0, 0)),
        ],
        out_specs=pl.BlockSpec((1, B, F2), lambda i: (i, 0, 0)),
        out_shape=jax.ShapeDtypeStruct((2, B, F2), jnp.float32),
        compiler_params=pltpu.CompilerParams(
            dimension_semantics=("arbitrary",), vmem_limit_bytes=VMEM_LIMIT),
    )(x, adain_w, adain_b)


def _fold_rgb(a, c, w_rgb, b_rgb):
    """Fold the block's AdaIN affine into per-batch 1x1-conv (torgb) weights."""
    B = a.shape[0]
    C = w_rgb.shape[0]
    a2 = a.reshape(B, C)
    c2 = c.reshape(B, C)
    w32 = w_rgb.astype(jnp.float32)
    wf = (a2[:, :, None] * w32[None]).astype(jnp.bfloat16)        # (B, C, 3)
    bf = (c2 @ w32 + b_rgb).reshape(B, 1, 3)                      # (B, 1, 3) f32
    return wf, bf


def torgb_base(t, a, c, w_rgb, b_rgb):
    """tr: 1x1 conv 512 -> 3, only ever runs at 8x8 (tiny -> one tile per batch)."""
    B, H, W, C = t.shape
    wf, bf = _fold_rgb(a, c, w_rgb, b_rgb)
    HW = H * W
    out = pl.pallas_call(
        _rgb_kernel,
        grid=(B,),
        in_specs=[
            pl.BlockSpec((1, HW, C), lambda i: (i, 0, 0)),
            pl.BlockSpec((1, C, 3), lambda i: (i, 0, 0)),
            pl.BlockSpec((1, 1, 3), lambda i: (i, 0, 0)),
        ],
        out_specs=pl.BlockSpec((1, HW, 3), lambda i: (i, 0, 0)),
        out_shape=jax.ShapeDtypeStruct((B, HW, 3), jnp.float32),
        compiler_params=pltpu.CompilerParams(
            dimension_semantics=("parallel",), vmem_limit_bytes=VMEM_LIMIT),
    )(t.reshape(B, HW, C), wf, bf)
    return out.reshape(B, H, W, 3)


def fadein(t, a, c, w_rgb, b_rgb, img_prev, layer_level):
    """FadeIN: torgb(feat) blended with the (in-kernel) 2x-upsampled previous image."""
    frac = layer_level - int(layer_level)
    alpha = 1.0 if frac > 0.5 else 2.0 * frac
    B, H, W, C = t.shape
    wf, bf = _fold_rgb(a, c, w_rgb, b_rgb)
    TH = _pick_rows_fadein(H, W, C)
    n_rt = H // TH
    alpha_arr = jnp.full((1,), alpha, jnp.float32)
    return pl.pallas_call(
        _fadein_kernel,
        grid=(B, n_rt),
        in_specs=[
            pl.BlockSpec(memory_space=pltpu.MemorySpace.SMEM),               # alpha
            pl.BlockSpec((1, TH, W, C), lambda b_, r: (b_, r, 0, 0)),
            pl.BlockSpec((1, TH // 2, W // 2, 3), lambda b_, r: (b_, r, 0, 0)),
            pl.BlockSpec((1, C, 3), lambda b_, r: (b_, 0, 0)),
            pl.BlockSpec((1, 1, 3), lambda b_, r: (b_, 0, 0)),
        ],
        out_specs=pl.BlockSpec((1, TH, W, 3), lambda b_, r: (b_, r, 0, 0)),
        out_shape=jax.ShapeDtypeStruct((B, H, W, 3), jnp.float32),
        compiler_params=pltpu.CompilerParams(
            dimension_semantics=("parallel", "parallel"),
            vmem_limit_bytes=VMEM_LIMIT),
    )(alpha_arr, t, img_prev, wf, bf)


# ---------------------------------------------------------------------------
# Parameters + forward (mirrors the PyTorch module)
# ---------------------------------------------------------------------------
def init_params(key):
    def nrm(k, shape, std, dtype=jnp.float32):
        return (std * jax.random.normal(k, shape, jnp.float32)).astype(dtype)

    keys = iter(jax.random.split(key, 256))
    p = {}
    for blk in range(3, 10):
        fin, fout = feat_size(blk), feat_size(blk + 1)
        d = {'feat_out': fout}
        if blk == 3:
            d['const'] = jnp.ones((1, 8, 8, 512), jnp.float32)   # torch (1,512,8,8) NCHW
        else:
            # ConvTranspose2d weight (Cin,Cout,kh,kw) -> (kh,kw,Cin,Cout) bf16; used by
            # the 4-phase sub-pixel kernel (no flip needed in that formulation).
            w_pt = nrm(next(keys), (fin, fout, 3, 3), 0.02)
            d['conv1_w'] = jnp.transpose(w_pt, (2, 3, 0, 1)).astype(jnp.bfloat16)
            d['conv1_b'] = jnp.full((fout,), 1.0, jnp.float32)
        d['noise_w1'] = 0.1 * jax.random.normal(next(keys), (fout,), jnp.float32)
        d['noise_w2'] = 0.1 * jax.random.normal(next(keys), (fout,), jnp.float32)
        d['adain_w'] = jnp.stack(
            [nrm(next(keys), (512, 2 * fout), 0.005),
             nrm(next(keys), (512, 2 * fout), 0.005)], axis=0)    # (2, 512, 2*fout)
        d['adain_b'] = jnp.zeros((2, 1, 2 * fout), jnp.float32)
        d['conv2_w'] = nrm(next(keys), (3, 3, fout, fout), 0.02, jnp.bfloat16)
        d['conv2_b'] = jnp.full((fout,), 1.0, jnp.float32)
        p[f'block{blk}'] = d
    p['tr_w'] = nrm(next(keys), (512, 3), 0.02, jnp.bfloat16)
    p['tr_b'] = jnp.zeros((3,), jnp.float32)
    for blk in range(4, 10):                                      # FadeIN1..6 torgb
        f = feat_size(blk + 1)
        p[f'fade{blk}_w'] = nrm(next(keys), (f, 3), 0.02, jnp.bfloat16)
        p[f'fade{blk}_b'] = jnp.zeros((3,), jnp.float32)
    return p


def _affine_from(sums, style, n_pix):
    """AdaIN (instance_norm + style_mod, reference math) as a per-(b, c) affine."""
    C = sums.shape[-1]
    m = sums / float(n_pix)
    r = lax.rsqrt(m + EPS)
    sc = style[:, :C] + 1.0
    a = r * sc
    c = style[:, C:] - m * a
    B = sums.shape[0]
    return a.reshape(B, 1, C), c.reshape(B, 1, C)


def block_forward(p, blocks, w_pair, carry, noise_key):
    """One synthesis block.  carry: None (block 3) or (t_prev, a_prev, c_prev)."""
    B = w_pair.shape[0]
    fout = p['feat_out']
    H = 2 ** blocks

    k1, k2 = jax.random.split(noise_key)
    # Fresh per forward, shared across the batch (as in the reference apply_noise).
    noise1 = jax.random.normal(k1, (H, H), jnp.float32)
    noise2 = jax.random.normal(k2, (H, H), jnp.float32)
    nz1 = (noise1[:, :, None] * p['noise_w1'][None, None, :]).astype(jnp.bfloat16)
    nz2 = (noise2[:, :, None] * p['noise_w2'][None, None, :]).astype(jnp.bfloat16)

    styles = style_linears(w_pair, p['adain_w'], p['adain_b'])    # (2, B, 2*fout)

    if blocks == 3:
        xc = jnp.broadcast_to(p['const'], (B, H, H, 512))
        x1 = const_epilogue(xc, nz1, styles[0, :, :fout], styles[0, :, fout:])
        t_in = x1
        a_in = jnp.ones((B, 1, fout), jnp.float32)
        c_in = jnp.zeros((B, 1, fout), jnp.float32)
    else:
        t_prev, a_prev, c_prev = carry
        t1, sums1 = deconv_passA(t_prev, a_prev, c_prev,
                                 p['conv1_w'], p['conv1_b'], nz1)
        a1, c1 = _affine_from(sums1, styles[0], H * H)
        t_in, a_in, c_in = t1, a1, c1

    t2, sums2 = conv3x3_passA(t_in, a_in, c_in, p['conv2_w'], p['conv2_b'], nz2)
    a2, c2 = _affine_from(sums2, styles[1], H * H)
    return t2, a2, c2


def g_synthesis_forward(params, dlatents_in, layer_level, noise_key):
    """dlatents_in: (B, 14, 512); layer_level: python float in [3, 9.x]."""
    keys = jax.random.split(noise_key, 7)
    t, a, c = block_forward(params['block3'], 3, dlatents_in[:, 0:2], None, keys[0])
    img = torgb_base(t, a, c, params['tr_w'], params['tr_b'])
    if layer_level == 3:
        return img
    for blk in range(4, 10):
        w_pair = dlatents_in[:, 2 * (blk - 3):2 * (blk - 3) + 2]
        t, a, c = block_forward(params[f'block{blk}'], blk, w_pair, (t, a, c),
                                keys[blk - 3])
        img = fadein(t, a, c, params[f'fade{blk}_w'], params[f'fade{blk}_b'],
                     img, layer_level)
        if int(layer_level) == blk:
            return img
    return 1   # mirrors the reference fall-through


if __name__ == "__main__":
    key = jax.random.PRNGKey(0)
    pkey, wkey, nkey = jax.random.split(key, 3)

    params = init_params(pkey)
    B = 2
    dlatents_in = jax.random.normal(wkey, (B, 14, 512), jnp.float32)
    layer_level = 4.25   # block1 + tr + block2 + FadeIN1 -> (B, 16, 16, 3)

    out = g_synthesis_forward(params, dlatents_in, layer_level, nkey)
    out = jax.block_until_ready(out)
    assert out.shape == (B, 16, 16, 3)
    print("KERNEL_OK")
</pallas_src>

<mosaic_0001>
module attributes {stable_mosaic.version = 11 : i64} {
  func.func @_style_kernel(%arg0: i32, %arg1: memref<1x2x512xf32, #tpu.memory_space<vmem>>, %arg2: memref<1x512x1024xf32, #tpu.memory_space<vmem>>, %arg3: memref<1x1x1024xf32, #tpu.memory_space<vmem>>, %arg4: memref<1x2x1024xf32, #tpu.memory_space<vmem>>) attributes {dimension_semantics = [#tpu.dimension_semantics<arbitrary>], iteration_bounds = array<i64: 2>, scalar_prefetch = 0 : i64, scratch_operands = 0 : i64, tpu.core_type = #tpu.core_type<tc>, window_params = [{transform_indices = @transform_0, window_bounds = array<i64: 1, 2, 512>}, {transform_indices = @transform_1, window_bounds = array<i64: 1, 512, 1024>}, {transform_indices = @transform_2, window_bounds = array<i64: 1, 1, 1024>}, {transform_indices = @transform_3, window_bounds = array<i64: 1, 2, 1024>}]} {
    %c0 = arith.constant 0 : index
    %c0_0 = arith.constant 0 : index
    %c0_1 = arith.constant 0 : index
    %0 = vector.load %arg1[%c0, %c0_0, %c0_1] : memref<1x2x512xf32, #tpu.memory_space<vmem>>, vector<1x2x512xf32>
    %1 = vector.shape_cast %0 : vector<1x2x512xf32> to vector<2x512xf32>
    %c0_2 = arith.constant 0 : index
    %c0_3 = arith.constant 0 : index
    %c0_4 = arith.constant 0 : index
    %2 = vector.load %arg2[%c0_2, %c0_3, %c0_4] : memref<1x512x1024xf32, #tpu.memory_space<vmem>>, vector<1x512x1024xf32>
    %3 = vector.shape_cast %2 : vector<1x512x1024xf32> to vector<512x1024xf32>
    %cst = arith.constant dense<0.000000e+00> : vector<2x1024xf32>
    %4 = tpu.matmul %1, %3, %cst {dimension_numbers = #tpu.dot_dimension_numbers<[1], [0], [0], [1], [0, 0, 1, 1], [], []>} : vector<2x512xf32>, vector<512x1024xf32>, vector<2x1024xf32> -> vector<2x1024xf32>
    %c0_5 = arith.constant 0 : index
    %c0_6 = arith.constant 0 : index
    %c0_7 = arith.constant 0 : index
    %5 = vector.load %arg3[%c0_5, %c0_6, %c0_7] : memref<1x1x1024xf32, #tpu.memory_space<vmem>>, vector<1x1x1024xf32>
    %6 = vector.shape_cast %5 : vector<1x1x1024xf32> to vector<1x1024xf32>
    %7 = vector.broadcast %6 : vector<1x1024xf32> to vector<2x1024xf32>
    %8 = arith.addf %4, %7 : vector<2x1024xf32>
    %c0_8 = arith.constant 0 : index
    %c0_9 = arith.constant 0 : index
    %c0_10 = arith.constant 0 : index
    %9 = vector.load %arg4[%c0_8, %c0_9, %c0_10] : memref<1x2x1024xf32, #tpu.memory_space<vmem>>, vector<1x2x1024xf32>
    %10 = vector.shape_cast %9 : vector<1x2x1024xf32> to vector<2x1024xf32>
    %11 = vector.shape_cast %8 : vector<2x1024xf32> to vector<1x2x1024xf32>
    tpu.vector_store %arg4[%c0_8, %c0_9, %c0_10], %11 {strides = array<i32>} : memref<1x2x1024xf32, #tpu.memory_space<vmem>>, vector<1x2x1024xf32>,
    return
  }
  func.func @transform_0(%arg0: i32) -> (i32, i32, i32) {
    %c0_i32 = arith.constant 0 : i32
    %c0_i32_0 = arith.constant 0 : i32
    %c0_i32_1 = arith.constant 0 : i32
    return %arg0, %c0_i32, %c0_i32_0 : i32, i32, i32
  }
  func.func @transform_1(%arg0: i32) -> (i32, i32, i32) {
    %c0_i32 = arith.constant 0 : i32
    %c0_i32_0 = arith.constant 0 : i32
    %c0_i32_1 = arith.constant 0 : i32
    return %arg0, %c0_i32, %c0_i32_0 : i32, i32, i32
  }
  func.func @transform_2(%arg0: i32) -> (i32, i32, i32) {
    %c0_i32 = arith.constant 0 : i32
    %c0_i32_0 = arith.constant 0 : i32
    %c0_i32_1 = arith.constant 0 : i32
    return %arg0, %c0_i32, %c0_i32_0 : i32, i32, i32
  }
  func.func @transform_3(%arg0: i32) -> (i32, i32, i32) {
    %c0_i32 = arith.constant 0 : i32
    %c0_i32_0 = arith.constant 0 : i32
    %c0_i32_1 = arith.constant 0 : i32
    return %arg0, %c0_i32, %c0_i32_0 : i32, i32, i32
  }
}

</mosaic_0001>

<bundles_post_ra>
// kernel: tpu_custom_call.1
= control target key start
LH: loop header
LB: loop body
LE: loop exit
PB: predicated region body
PF: predicated region fallthrough
CT: control target
= control target key end

     0   :  { %s2657_s0 = inlined_call_operand.hbm [shape: f32[2,2,512], index: 0, kind: input, shape index: {}]   ;;  %s2658_s1 = inlined_call_operand.hbm [shape: f32[2,512,1024], index: 1, kind: input, shape index: {}]   ;;  %s2659_s2 = inlined_call_operand.hbm [shape: f32[2,1,1024], index: 2, kind: input, shape index: {}]   ;;  %s2660_s3 = inlined_call_operand.hbm [shape: f32[2,2,1024], index: 3, kind: output, shape index: {}]  }
   0x1   :  { %2662 = sst [smem:[#allocation14_spill]] %s2658_s1 }
   0x2   :  { %8 = vsyncpa [#allocation3], 0 }
   0x3   :  { %10 = vsyncpa [#allocation3 + $0x1], 0 }
   0x4   :  { %11 = vsyncpa [#allocation6], 0 }
   0x5   :  { %13 = vsyncpa [#allocation6 + $0x1], 0 }
   0x6   :  { %14 = vsyncpa [#allocation4], 0 }
   0x7   :  { %16 = vsyncpa [#allocation4 + $0x1], 0  ;;  %s1875_s12 = smov 0   ;;  %s1877_s13 = smov 0  }
   0x8   :  { %s1879_s14 = smov 0   ;;  %s1881_s15 = smov 0  }
   0x9 LB: > { %2663 = sst [smem:[#allocation12_spill]] %s1847_s14  ;;  %s1896_s16 = sadd.s32 4294967295, %s1851_s15   ;;  %s1851_s15 = sphi %s1881_s15, %s2675_s15   ;;  %s1847_s14 = sphi %s1879_s14, %s2672_s14   ;;  %s1843_s13 = sphi %s1877_s13, %s2674_s13   ;;  %s1839_s12 = sphi %s1875_s12, %s2673_s12  }
   0xa   : > { %s1605_s17 = sadd.s32 4294967294, %s1851_s15   ;;  %s1900_s18 = sadd.s32 1, %s1851_s15  }
   0xb   : > { %s29_s19 = sadd.s32 1, %s1847_s14  ;;  %s26_s20 = ssub.s32 %s1851_s15, %s1900_s18 }
   0xc   : > { %p36_p0 = scmp.ne.s32.totalorder %s1847_s14, %s1843_s13  ;;  %p27_p1 = scmp.eq.s32.totalorder %s26_s20, 0 }
   0xd   : > { %p37_p2 = scmp.eq.s32.totalorder %s1851_s15, 0  ;;  %p42_p3 = scmp.ne.s32.totalorder %s1843_s13, %s1839_s12 }
   0xe   : > { %p43_p4 = scmp.eq.s32.totalorder %s1896_s16, 0  ;;  %p118_p7 = scmp.eq.s32.totalorder %s1896_s16, 1 }
   0xf   : > { %s1912_s21 = scalar_select %p27_p1, %s1847_s14, %s29_s19  }
  0x10   : > { %p38_p5 = por %p37_p2, %p36_p0  ;;  %p1914_p6 = por %p43_p4, %p42_p3 }
  0x11   : > { %2664 = sst [smem:[#allocation13_spill]] %s1912_s21  ;;  %p124_p8 = scmp.eq.s32.totalorder %s1605_s17, 1 }
  0x12   : > { %p1607_p9 = scmp.ge.s32.totalorder %s1851_s15, 2  ;;  %p1651_p10 = scmp.lt.s32.totalorder %s1851_s15, 2 }
  0x13   : > { %p1921_p11 = por %p118_p7, %p36_p0  ;;  %p1925_p12 = por %p124_p8, %p42_p3 }
  0x14   : > { %s1930_s25 = sand.u32 1, %s1847_s14   ;;  %p1932_p13 = pnand %p1651_p10, %p38_p5 }
  0x15   : > { %s164_s27 = sand.u32 1, %s1851_s15   ;;  %s1611_s28 = sshll.u32 %s1930_s25, 12 }
  0x16   : > { %s1627_s29 = sshll.u32 %s1851_s15, 12  ;;  %s2669_s1 = sld [smem:[#allocation14_spill]] }
  0x17   : > { %s168_s6 = scalar_lea.vmem [#allocation5], %s1611_s28  ;;  %p1616_p0 = scmp.ge.s32.totalorder %s1851_s15, 1 }
  0x18   : > { %s176_s7 = sshll.u32 %s168_s6, 4  ;;  %s1943_s9 = scalar_lea.sflag [#allocation6], %s164_s27  ;;  %s177_s7 = int_to_ptr.vmem [resolvable:$true] %s176_s7 }
  0x19   : > { %p1695_p2 = pneg %p1932_p13 }
  0x1c   : > { %s173_s5 = scalar_lea.hbm %s2669_s1, %s1627_s29  ;;  %s1698_s20 = scalar_lea.hbm %s2669_s1, 8192 }
  0x1d   : > { %s174_s8 = sshll.u32 %s173_s5, 4  ;;  %s175_s8 = int_to_ptr.hbm [resolvable:$true] %s174_s8 }
  0x1e   : > { %s1691_s10 = sshra.s32 %s175_s8, 4  ;;  %s1692_s10 = int_to_ptr.hbm [resolvable:$true] %s1691_s10 }
  0x1f   : > { %s1693_s11 = scalar_lea.hbm %s1692_s10, 4096  ;;  %p1699_p5 = scmp.lt.s32.totalorder %s1692_s10, %s2669_s1 }
  0x20   : > { %p1694_p1 = scmp.ne.s32.totalorder %s1692_s10, %s1693_s11  ;;  %p1700_p7 = scmp.lt.s32.totalorder %s1698_s20, %s1693_s11 }
  0x22   : > { %p1696_p3 = pnand %p1695_p2, %p1694_p1  ;;  %p1701_p8 = por %p1700_p7, %p1699_p5 }
  0x24   : > { %p1697_p4 = pneg %p1696_p3 }
  0x26   : > { %p1702_p10 = pnand %p1701_p8, %p1697_p4 }
  0x28   : > { %1705 = shalt.err (!%p1702_p10)
}
  0x29   : > { %s1853_s27 = smov 1024   ;;  %s1854_s30 = smov 64  }
  0x2a   : > { %1643 = dma.hbm_to_vmem [thread:$0]  (!%p1932_p13), %s175_s8, 65536, %s177_s7, %s1943_s9, %s1853_s27, %s1853_s27, %s1854_s30  }
  0x2b   : > { %p203_p1 = scmp.lt.s32.totalorder %s1851_s15, 3  ;;  %s1608_s4 = sshll.u32 %s1930_s25, 3 }
  0x2c   : > { %s1626_s5 = sshll.u32 %s1851_s15, 3  ;;  %s148_s19 = scalar_lea.vmem [#allocation2], %s1608_s4 }
  0x2d   : > { %p1964_p3 = pnand %p1616_p0, %p203_p1  ;;  %s153_s17 = scalar_lea.hbm %s2657_s0, %s1626_s5 }
  0x2e   : > { %s157_s20 = sshll.u32 %s148_s19, 4  ;;  %s155_s28 = sshll.u32 %s153_s17, 4  ;;  %s158_s20 = int_to_ptr.vmem [resolvable:$true] %s157_s20  ;;  %s156_s28 = int_to_ptr.hbm [resolvable:$true] %s155_s28 }
  0x2f   : > { %s145_s29 = scalar_lea.sflag [#allocation3], %s1930_s25  ;;  %s1721_s7 = sshra.s32 %s156_s28, 4  ;;  %s1722_s7 = int_to_ptr.hbm [resolvable:$true] %s1721_s7 }
  0x30   : > { %s1723_s8 = scalar_lea.hbm %s1722_s7, 8  ;;  %s1728_s1 = scalar_lea.hbm %s2657_s0, 16 }
  0x31   : > { %p1724_p4 = scmp.ne.s32.totalorder %s1722_s7, %s1723_s8  ;;  %p1729_p7 = scmp.lt.s32.totalorder %s1722_s7, %s2657_s0 }
  0x32   : > { %p1730_p8 = scmp.lt.s32.totalorder %s1728_s1, %s1723_s8 }
  0x33   : > { %p1726_p0 = pnand %p1724_p4, %p1695_p2 }
  0x34   : > { %p1731_p10 = por %p1730_p8, %p1729_p7 }
  0x35   : > { %p1727_p5 = pneg %p1726_p0 }
  0x37   : > { %p1732_p1 = pnand %p1731_p10, %p1727_p5 }
  0x39   : > { %1735 = shalt.err (!%p1732_p1)
}
  0x3a   : > { %1640 = dma.hbm_to_vmem [thread:$0]  (!%p1932_p13), %s156_s28, 128, %s158_s20, %s145_s29  }
  0x3b   : > { %s194_s19 = scalar_lea.hbm %s2659_s2, %s1626_s5  ;;  %s190_s21 = scalar_lea.vmem [#allocation7], %s1608_s4 }
  0x3c   : > { %s198_s14 = sshll.u32 %s190_s21, 4  ;;  %s196_s27 = sshll.u32 %s194_s19, 4  ;;  %s199_s14 = int_to_ptr.vmem [resolvable:$true] %s198_s14  ;;  %s197_s27 = int_to_ptr.hbm [resolvable:$true] %s196_s27 }
  0x3d   : > { %s1751_s30 = sshra.s32 %s197_s27, 4  ;;  %s1758_s20 = scalar_lea.hbm %s2659_s2, 16  ;;  %s1752_s30 = int_to_ptr.hbm [resolvable:$true] %s1751_s30 }
  0x3e   : > { %s1753_s7 = scalar_lea.hbm %s1752_s30, 8  ;;  %p1759_p7 = scmp.lt.s32.totalorder %s1752_s30, %s2659_s2 }
  0x3f   : > { %p1754_p4 = scmp.ne.s32.totalorder %s1752_s30, %s1753_s7  ;;  %p1760_p8 = scmp.lt.s32.totalorder %s1758_s20, %s1753_s7 }
  0x41   : > { %p1756_p0 = pnand %p1754_p4, %p1695_p2  ;;  %p1761_p10 = por %p1760_p8, %p1759_p7 }
  0x43   : > { %p1757_p5 = pneg %p1756_p0 }
  0x45   : > { %p1762_p1 = pnand %p1761_p10, %p1757_p5 }
  0x47   : > { %1765 = shalt.err (!%p1762_p1)
}
  0x48   : > { %1646 = dma.hbm_to_vmem [thread:$0]  (!%p1932_p13), %s197_s27, 128, %s199_s14, %s1943_s9  }
  0x49   : > { %207 = sbr.rel (%p1964_p3) target bundleno = 525 (0x20d), region = 32  ;;  %s2001_s21 = sand.u32 (!%p1964_p3), 1, %s1843_s13  }
  0x4a   : > { %s1617_s4 = sshll.u32 (!%p1964_p3), %s2001_s21, 3  ;;  %s210_s5 = scalar_lea.sflag (!%p1964_p3), [#allocation3], %s2001_s21 }
  0x4b   : > { %s2007_s10 = scalar_lea.vmem (!%p1964_p3), [#allocation2], %s1617_s4 }
  0x4e   : > { %1826 = dma.done.wait (%p1914_p6), %s210_s5, 128  }
  0x4f   : > { %1828 = vsyncadd (%p1914_p6), %s210_s5, 4294967168  ;;  %s219_s14 = sand.u32 1, %s1896_s16   ;;  %s1618_s26 = sshll.u32 %s2001_s21, 12 }
  0x50   : > { %s220_s9 = scalar_lea.sflag [#allocation6], %s219_s14  ;;  %s2015_s6 = scalar_lea.vmem [#allocation5], %s1618_s26 }
  0x51   : > { %1830 = dma.done.wait (%p1914_p6), %s220_s9, 65664  }
  0x52   : > { %1832 = vsyncadd (%p1914_p6), %s220_s9, 4294901632  ;;  %v644_v0 = vld [vmem:[%s2015_s6 + $0xbc0] sm:$0xff]  ;;  %v645_v62 = vld [vmem:[%s2015_s6 + $0xbc8] sm:$0xff]  ;;  %s233_s22 = scalar_lea.vmem [#allocation7], %s1617_s4  ;;  %s1620_s11 = sshll.u32 %s2001_s21, 4  ;;  %vm1462_vm0 = vcmask 1041408  }
  0x53   : > { %v388_v1 = vld [vmem:[%s2015_s6 + $0x3c0] sm:$0xff]  ;;  %848 = vmatpush.msra.mxu2 %v644_v0  ;;  %v389_v0 = vld [vmem:[%s2015_s6 + $0x3c8] sm:$0xff]  ;;  %vm1464_vm1 = vcmask 1045508   ;;  %vm1466_vm2 = vcmask 1043456   ;;  %s2612_s25 = scalar_lea.vmem [#allocation8], %s1620_s11  ;;  %s1628_s17 = sshll.u32 %s1896_s16, 4 }
  0x54   : > { %v636_v2 = vld [vmem:[%s2015_s6 + $0xb80] sm:$0xff]  ;;  %808 = vmatpush.msra.mxu0 %v388_v1  ;;  %v773_v1 = vld [vmem:[%s2015_s6 + $0xfc8] sm:$0xff]  ;;  %s1487_s30 = scalar_lea.hbm %s2660_s3, %s1628_s17  ;;  %s1489_s7 = sshll.u32 %s2612_s25, 4  ;;  %s1490_s7 = int_to_ptr.vmem [resolvable:$true] %s1489_s7 }
  0x55   : > { %v772_v3 = vld [vmem:[%s2015_s6 + $0xfc0] sm:$0xff]  ;;  %849 = vmatpush.msra.mxu2 %v636_v2  ;;  %v637_v2 = vld [vmem:[%s2015_s6 + $0xb88] sm:$0xff]  ;;  %s1491_s1 = sshll.u32 %s1487_s30, 4  ;;  %s1476_s16 = scalar_lea.sflag [#allocation4], %s2001_s21  ;;  %s1492_s1 = int_to_ptr.hbm [resolvable:$true] %s1491_s1 }
  0x56   : > { %v380_v4 = vld [vmem:[%s2015_s6 + $0x380] sm:$0xff]  ;;  %868 = vmatpush.msra.mxu3 %v772_v3  ;;  %s1795_s8 = sshra.s32 %s1492_s1, 4  ;;  %s1801_s4 = scalar_lea.hbm %s2660_s3, 32  ;;  %s1796_s8 = int_to_ptr.hbm [resolvable:$true] %s1795_s8 }
  0x57   : > { %v516_v5 = vld [vmem:[%s2015_s6 + $0x7c0] sm:$0xff]  ;;  %809 = vmatpush.msra.mxu0 %v380_v4  ;;  %v381_v4 = vld [vmem:[%s2015_s6 + $0x388] sm:$0xff]  ;;  %s1797_s20 = scalar_lea.hbm %s1796_s8, 16  ;;  %p1802_p3 = scmp.lt.s32.totalorder %s1796_s8, %s2660_s3 }
  0x58   : > { %828 = vmatpush.msra.mxu1 %v516_v5  ;;  %v628_v6 = vld [vmem:[%s2015_s6 + $0xb40] sm:$0xff]  ;;  %v517_v5 = vld [vmem:[%s2015_s6 + $0x7c8] sm:$0xff]  ;;  %p1798_p6 = scmp.ne.s32.totalorder %s1796_s8, %s1797_s20  ;;  %p1803_p4 = scmp.lt.s32.totalorder %s1801_s4, %s1797_s20 }
  0x59   : > { %v764_v7 = vld [vmem:[%s2015_s6 + $0xf80] sm:$0xff]  ;;  %850 = vmatpush.msra.mxu2 %v628_v6  ;;  %v629_v6 = vld [vmem:[%s2015_s6 + $0xb48] sm:$0xff] }
  0x5a   : > { %v372_v8 = vld [vmem:[%s2015_s6 + $0x340] sm:$0xff]  ;;  %869 = vmatpush.msra.mxu3 %v764_v7  ;;  %v765_v7 = vld [vmem:[%s2015_s6 + $0xf88] sm:$0xff]  ;;  %p1799_p13 = pnand %p1798_p6, %p1921_p11  ;;  %p1804_p0 = por %p1803_p4, %p1802_p3 }
  0x5b   : > { %v508_v9 = vld [vmem:[%s2015_s6 + $0x780] sm:$0xff]  ;;  %810 = vmatpush.msra.mxu0 %v372_v8  ;;  %v373_v8 = vld [vmem:[%s2015_s6 + $0x348] sm:$0xff] }
  0x5c   : > { %v756_v10 = vld [vmem:[%s2015_s6 + $0xf40] sm:$0xff]  ;;  %829 = vmatpush.msra.mxu1 %v508_v9  ;;  %v509_v9 = vld [vmem:[%s2015_s6 + $0x788] sm:$0xff]  ;;  %p1800_p2 = pneg %p1799_p13 }
  0x5d   : > { %v620_v11 = vld [vmem:[%s2015_s6 + $0xb00] sm:$0xff]  ;;  %870 = vmatpush.msra.mxu3 %v756_v10  ;;  %v621_v10 = vld [vmem:[%s2015_s6 + $0xb08] sm:$0xff] }
  0x5e   : > { %v364_v12 = vld [vmem:[%s2015_s6 + $0x300] sm:$0xff]  ;;  %851 = vmatpush.msra.mxu2 %v620_v11  ;;  %v757_v11 = vld [vmem:[%s2015_s6 + $0xf48] sm:$0xff]  ;;  %p1805_p5 = pnand %p1804_p0, %p1800_p2 }
  0x5f   : > { %v500_v13 = vld [vmem:[%s2015_s6 + $0x740] sm:$0xff]  ;;  %811 = vmatpush.msra.mxu0 %v364_v12  ;;  %v365_v12 = vld [vmem:[%s2015_s6 + $0x308] sm:$0xff] }
  0x60   : > { %v748_v14 = vld [vmem:[%s2015_s6 + $0xf00] sm:$0xff]  ;;  %830 = vmatpush.msra.mxu1 %v500_v13  ;;  %v501_v13 = vld [vmem:[%s2015_s6 + $0x748] sm:$0xff] }
  0x61   : > { %v492_v15 = vld [vmem:[%s2015_s6 + $0x700] sm:$0xff]  ;;  %871 = vmatpush.msra.mxu3 %v748_v14  ;;  %v267_v14 = vld [vmem:[%s2007_s10] sm:$0xff] }
  0x62   : > { %v612_v16 = vld [vmem:[%s2015_s6 + $0xac0] sm:$0xff]  ;;  %831 = vmatpush.msra.mxu1 %v492_v15  ;;  %v613_v15 = vld [vmem:[%s2015_s6 + $0xac8] sm:$0xff]  ;;  %799 = vst [vmem:[#allocation1] ss:$4 sm:$0xff] %v267_v14  ;;  %v622_v14 = vld [vmem:[%s2015_s6 + $0xb10] sm:$0xff] }
  0x63   : > { %v356_v17 = vld [vmem:[%s2015_s6 + $0x2c0] sm:$0xff]  ;;  %852 = vmatpush.msra.mxu2 %v612_v16  ;;  %v749_v16 = vld [vmem:[%s2015_s6 + $0xf08] sm:$0xff] }
  0x64   : > { %v740_v18 = vld [vmem:[%s2015_s6 + $0xec0] sm:$0xff]  ;;  %812 = vmatpush.msra.mxu0 %v356_v17  ;;  %v357_v17 = vld [vmem:[%s2015_s6 + $0x2c8] sm:$0xff] }
  0x65   : > { %v484_v19 = vld [vmem:[%s2015_s6 + $0x6c0] sm:$0xff]  ;;  %872 = vmatpush.msra.mxu3 %v740_v18  ;;  %v493_v18 = vld [vmem:[%s2015_s6 + $0x708] sm:$0xff] }
  0x66   : > { %v604_v20 = vld [vmem:[%s2015_s6 + $0xa80] sm:$0xff]  ;;  %832 = vmatpush.msra.mxu1 %v484_v19  ;;  %v605_v19 = vld [vmem:[%s2015_s6 + $0xa88] sm:$0xff] }
  0x67   : > { %v348_v21 = vld [vmem:[%s2015_s6 + $0x280] sm:$0xff]  ;;  %853 = vmatpush.msra.mxu2 %v604_v20  ;;  %v741_v20 = vld [vmem:[%s2015_s6 + $0xec8] sm:$0xff] }
  0x68   : > { %v732_v22 = vld [vmem:[%s2015_s6 + $0xe80] sm:$0xff]  ;;  %813 = vmatpush.msra.mxu0 %v348_v21  ;;  %v349_v21 = vld [vmem:[%s2015_s6 + $0x288] sm:$0xff] }
  0x69   : > { %v476_v23 = vld [vmem:[%s2015_s6 + $0x680] sm:$0xff]  ;;  %873 = vmatpush.msra.mxu3 %v732_v22  ;;  %v485_v22 = vld [vmem:[%s2015_s6 + $0x6c8] sm:$0xff] }
  0x6a   : > { %v596_v24 = vld [vmem:[%s2015_s6 + $0xa40] sm:$0xff]  ;;  %833 = vmatpush.msra.mxu1 %v476_v23  ;;  %v597_v23 = vld [vmem:[%s2015_s6 + $0xa48] sm:$0xff] }
  0x6b   : > { %v340_v25 = vld [vmem:[%s2015_s6 + $0x240] sm:$0xff]  ;;  %854 = vmatpush.msra.mxu2 %v596_v24  ;;  %v733_v24 = vld [vmem:[%s2015_s6 + $0xe88] sm:$0xff] }
  0x6c   : > { %v724_v26 = vld [vmem:[%s2015_s6 + $0xe40] sm:$0xff]  ;;  %814 = vmatpush.msra.mxu0 %v340_v25  ;;  %v341_v25 = vld [vmem:[%s2015_s6 + $0x248] sm:$0xff] }
  0x6d   : > { %v468_v27 = vld [vmem:[%s2015_s6 + $0x640] sm:$0xff]  ;;  %874 = vmatpush.msra.mxu3 %v724_v26  ;;  %v477_v26 = vld [vmem:[%s2015_s6 + $0x688] sm:$0xff] }
  0x6e   : > { %v588_v28 = vld [vmem:[%s2015_s6 + $0xa00] sm:$0xff]  ;;  %834 = vmatpush.msra.mxu1 %v468_v27  ;;  %v589_v27 = vld [vmem:[%s2015_s6 + $0xa08] sm:$0xff] }
  0x6f   : > { %v332_v29 = vld [vmem:[%s2015_s6 + $0x200] sm:$0xff]  ;;  %855 = vmatpush.msra.mxu2 %v588_v28  ;;  %v725_v28 = vld [vmem:[%s2015_s6 + $0xe48] sm:$0xff] }
  0x70   : > { %v716_v30 = vld [vmem:[%s2015_s6 + $0xe00] sm:$0xff]  ;;  %815 = vmatpush.msra.mxu0 %v332_v29  ;;  %v333_v29 = vld [vmem:[%s2015_s6 + $0x208] sm:$0xff] }
  0x71   : > { %v460_v31 = vld [vmem:[%s2015_s6 + $0x600] sm:$0xff]  ;;  %875 = vmatpush.msra.mxu3 %v716_v30  ;;  %v469_v30 = vld [vmem:[%s2015_s6 + $0x648] sm:$0xff] }
  0x72   : > { %v580_v32 = vld [vmem:[%s2015_s6 + $0x9c0] sm:$0xff]  ;;  %835 = vmatpush.msra.mxu1 %v460_v31  ;;  %v581_v31 = vld [vmem:[%s2015_s6 + $0x9c8] sm:$0xff] }
  0x73   : > { %v324_v33 = vld [vmem:[%s2015_s6 + $0x1c0] sm:$0xff]  ;;  %856 = vmatpush.msra.mxu2 %v580_v32  ;;  %v717_v32 = vld [vmem:[%s2015_s6 + $0xe08] sm:$0xff] }
  0x74   : > { %v708_v34 = vld [vmem:[%s2015_s6 + $0xdc0] sm:$0xff]  ;;  %816 = vmatpush.msra.mxu0 %v324_v33  ;;  %v325_v33 = vld [vmem:[%s2015_s6 + $0x1c8] sm:$0xff] }
  0x75   : > { %v452_v35 = vld [vmem:[%s2015_s6 + $0x5c0] sm:$0xff]  ;;  %876 = vmatpush.msra.mxu3 %v708_v34  ;;  %v461_v34 = vld [vmem:[%s2015_s6 + $0x608] sm:$0xff] }
  0x76   : > { %v572_v36 = vld [vmem:[%s2015_s6 + $0x980] sm:$0xff]  ;;  %836 = vmatpush.msra.mxu1 %v452_v35  ;;  %v573_v35 = vld [vmem:[%s2015_s6 + $0x988] sm:$0xff] }
  0x77   : > { %v316_v37 = vld [vmem:[%s2015_s6 + $0x180] sm:$0xff]  ;;  %857 = vmatpush.msra.mxu2 %v572_v36  ;;  %v709_v36 = vld [vmem:[%s2015_s6 + $0xdc8] sm:$0xff] }
  0x78   : > { %v700_v38 = vld [vmem:[%s2015_s6 + $0xd80] sm:$0xff]  ;;  %817 = vmatpush.msra.mxu0 %v316_v37  ;;  %v317_v37 = vld [vmem:[%s2015_s6 + $0x188] sm:$0xff] }
  0x79   : > { %v444_v39 = vld [vmem:[%s2015_s6 + $0x580] sm:$0xff]  ;;  %877 = vmatpush.msra.mxu3 %v700_v38  ;;  %v453_v38 = vld [vmem:[%s2015_s6 + $0x5c8] sm:$0xff] }
  0x7a   : > { %v564_v40 = vld [vmem:[%s2015_s6 + $0x940] sm:$0xff]  ;;  %837 = vmatpush.msra.mxu1 %v444_v39  ;;  %v565_v39 = vld [vmem:[%s2015_s6 + $0x948] sm:$0xff] }
  0x7b   : > { %v308_v41 = vld [vmem:[%s2015_s6 + $0x140] sm:$0xff]  ;;  %858 = vmatpush.msra.mxu2 %v564_v40  ;;  %v701_v40 = vld [vmem:[%s2015_s6 + $0xd88] sm:$0xff] }
  0x7c   : > { %v692_v42 = vld [vmem:[%s2015_s6 + $0xd40] sm:$0xff]  ;;  %818 = vmatpush.msra.mxu0 %v308_v41  ;;  %v309_v41 = vld [vmem:[%s2015_s6 + $0x148] sm:$0xff] }
  0x7d   : > { %v436_v43 = vld [vmem:[%s2015_s6 + $0x540] sm:$0xff]  ;;  %878 = vmatpush.msra.mxu3 %v692_v42  ;;  %v445_v42 = vld [vmem:[%s2015_s6 + $0x588] sm:$0xff] }
  0x7e   : > { %v556_v44 = vld [vmem:[%s2015_s6 + $0x900] sm:$0xff]  ;;  %838 = vmatpush.msra.mxu1 %v436_v43  ;;  %v557_v43 = vld [vmem:[%s2015_s6 + $0x908] sm:$0xff] }
  0x7f   : > { %v300_v45 = vld [vmem:[%s2015_s6 + $0x100] sm:$0xff]  ;;  %859 = vmatpush.msra.mxu2 %v556_v44  ;;  %v693_v44 = vld [vmem:[%s2015_s6 + $0xd48] sm:$0xff] }
  0x80   : > { %v684_v46 = vld [vmem:[%s2015_s6 + $0xd00] sm:$0xff]  ;;  %819 = vmatpush.msra.mxu0 %v300_v45  ;;  %v2130_v45 = vld.sshfl [vmem:[#allocation1 + $0x10] sm:$0xff pattern:$0x73625140] }
  0x81   : > { %v428_v47 = vld [vmem:[%s2015_s6 + $0x500] sm:$0xff]  ;;  %879 = vmatpush.msra.mxu3 %v684_v46  ;;  %v301_v46 = vld [vmem:[%s2015_s6 + $0x108] sm:$0xff] }
  0x82   : > { %v548_v48 = vld [vmem:[%s2015_s6 + $0x8c0] sm:$0xff]  ;;  %839 = vmatpush.msra.mxu1 %v428_v47  ;;  %v437_v47 = vld [vmem:[%s2015_s6 + $0x548] sm:$0xff] }
  0x83   : > { %v292_v49 = vld [vmem:[%s2015_s6 + $0xc0] sm:$0xff]  ;;  %860 = vmatpush.msra.mxu2 %v548_v48  ;;  %v549_v48 = vld [vmem:[%s2015_s6 + $0x8c8] sm:$0xff] }
  0x84   : > { %v676_v50 = vld [vmem:[%s2015_s6 + $0xcc0] sm:$0xff]  ;;  %820 = vmatpush.msra.mxu0 %v292_v49  ;;  %v685_v49 = vld [vmem:[%s2015_s6 + $0xd08] sm:$0xff] }
  0x85   : > { %v420_v51 = vld [vmem:[%s2015_s6 + $0x4c0] sm:$0xff]  ;;  %880 = vmatpush.msra.mxu3 %v676_v50  ;;  %v2136_v50 = vld.sshfl [vmem:[#allocation1] sm:$0xff pattern:$0x73625140] }
  0x86   : > { %v540_v52 = vld [vmem:[%s2015_s6 + $0x880] sm:$0xff]  ;;  %840 = vmatpush.msra.mxu1 %v420_v51 }
  0x87   : > { %v284_v53 = vld [vmem:[%s2015_s6 + $0x80] sm:$0xff]  ;;  %861 = vmatpush.msra.mxu2 %v540_v52  ;;  %v293_v52 = vld [vmem:[%s2015_s6 + $0xc8] sm:$0xff] }
  0x88   : > { %v668_v54 = vld [vmem:[%s2015_s6 + $0xc80] sm:$0xff]  ;;  %821 = vmatpush.msra.mxu0 %v284_v53  ;;  %v429_v53 = vld [vmem:[%s2015_s6 + $0x508] sm:$0xff] }
  0x89   : > { %v412_v55 = vld [vmem:[%s2015_s6 + $0x480] sm:$0xff]  ;;  %881 = vmatpush.msra.mxu3 %v668_v54  ;;  %v541_v54 = vld [vmem:[%s2015_s6 + $0x888] sm:$0xff] }
  0x8a   : > { %v532_v56 = vld [vmem:[%s2015_s6 + $0x840] sm:$0xff]  ;;  %841 = vmatpush.msra.mxu1 %v412_v55  ;;  %v677_v55 = vld [vmem:[%s2015_s6 + $0xcc8] sm:$0xff] }
  0x8b   : > { %v276_v57 = vld [vmem:[%s2015_s6 + $0x40] sm:$0xff]  ;;  %862 = vmatpush.msra.mxu2 %v532_v56  ;;  %v2146_v56 = vld.sshfl [vmem:[#allocation1 + $0x8] sm:$0xff pattern:$0x73625140] }
  0x8c   : > { %v660_v58 = vld [vmem:[%s2015_s6 + $0xc40] sm:$0xff]  ;;  %822 = vmatpush.msra.mxu0 %v276_v57  ;;  %v285_v57 = vld [vmem:[%s2015_s6 + $0x88] sm:$0xff] }
  0x8d   : > { %v404_v59 = vld [vmem:[%s2015_s6 + $0x440] sm:$0xff]  ;;  %882 = vmatpush.msra.mxu3 %v660_v58  ;;  %v421_v58 = vld [vmem:[%s2015_s6 + $0x4c8] sm:$0xff] }
  0x8e   : > { %v524_v60 = vld [vmem:[%s2015_s6 + $0x800] sm:$0xff]  ;;  %842 = vmatpush.msra.mxu1 %v404_v59  ;;  %v533_v59 = vld [vmem:[%s2015_s6 + $0x848] sm:$0xff] }
  0x8f   : > { %v268_v61 = vld [vmem:[%s2015_s6] sm:$0xff]  ;;  %863 = vmatpush.msra.mxu2 %v524_v60  ;;  %v669_v60 = vld [vmem:[%s2015_s6 + $0xc88] sm:$0xff] }
  0x90   : > { %v652_v63 = vld [vmem:[%s2015_s6 + $0xc00] sm:$0xff]  ;;  %823 = vmatpush.msra.mxu0 %v268_v61  ;;  %864 = vmatmul.f32.vlgmr.msra.gmra.mxu2 %v2130_v45  ;;  %v277_v61 = vld [vmem:[%s2015_s6 + $0x48] sm:$0xff] }
  0x91   : > { %v396_v3 = vld [vmem:[%s2015_s6 + $0x400] sm:$0xff]  ;;  %928 = vmatpush.msrb.mxu2 %v645_v62  ;;  %883 = vmatpush.msra.mxu3 %v652_v63  ;;  %v413_v62 = vld [vmem:[%s2015_s6 + $0x488] sm:$0xff] }
  0x92   : > { %888 = vmatpush.msrb.mxu0 %v389_v0  ;;  %843 = vmatpush.msra.mxu1 %v396_v3  ;;  %v2139_v51 = vld.sshfl [vmem:[#allocation1 + $0x18] sm:$0xff pattern:$0x73625140]  ;;  %v525_v63 = vld [vmem:[%s2015_s6 + $0x808] sm:$0xff] }
  0x93   : > { %948 = vmatpush.msrb.mxu3 %v773_v1  ;;  %929 = vmatpush.msrb.mxu2 %v637_v2  ;;  %v661_v0 = vld [vmem:[%s2015_s6 + $0xc48] sm:$0xff]  ;;  %v646_v2 = vld [vmem:[%s2015_s6 + $0xbd0] sm:$0xff] }
  0x94   : > { %889 = vmatpush.msrb.mxu0 %v381_v4  ;;  %908 = vmatpush.msrb.mxu1 %v517_v5  ;;  %v269_v1 = vld [vmem:[%s2015_s6 + $0x8] sm:$0xff]  ;;  %v390_v5 = vld [vmem:[%s2015_s6 + $0x3d0] sm:$0xff] }
  0x95   : > { %930 = vmatpush.msrb.mxu2 %v629_v6  ;;  %949 = vmatpush.msrb.mxu3 %v765_v7  ;;  %v405_v3 = vld [vmem:[%s2015_s6 + $0x448] sm:$0xff]  ;;  %v638_v6 = vld [vmem:[%s2015_s6 + $0xb90] sm:$0xff] }
  0x96   : > { %890 = vmatpush.msrb.mxu0 %v373_v8  ;;  %909 = vmatpush.msrb.mxu1 %v509_v9  ;;  %v653_v4 = vld [vmem:[%s2015_s6 + $0xc08] sm:$0xff]  ;;  %v774_v7 = vld [vmem:[%s2015_s6 + $0xfd0] sm:$0xff] }
  0x97   : > { %931 = vmatpush.msrb.mxu2 %v621_v10  ;;  %950 = vmatpush.msrb.mxu3 %v757_v11  ;;  %v397_v8 = vld [vmem:[%s2015_s6 + $0x408] sm:$0xff]  ;;  %v382_v9 = vld [vmem:[%s2015_s6 + $0x390] sm:$0xff] }
  0x98   : > { %891 = vmatpush.msrb.mxu0 %v365_v12  ;;  %910 = vmatpush.msrb.mxu1 %v501_v13  ;;  %v630_v10 = vld [vmem:[%s2015_s6 + $0xb50] sm:$0xff] }
  0x99   : > { %932 = vmatpush.msrb.mxu2 %v613_v15  ;;  %951 = vmatpush.msrb.mxu3 %v749_v16  ;;  %v518_v11 = vld [vmem:[%s2015_s6 + $0x7d0] sm:$0xff] }
  0x9a   : > { %892 = vmatpush.msrb.mxu0 %v357_v17  ;;  %911 = vmatpush.msrb.mxu1 %v493_v18  ;;  %v766_v12 = vld [vmem:[%s2015_s6 + $0xf90] sm:$0xff] }
  0x9b   : > { %933 = vmatpush.msrb.mxu2 %v605_v19  ;;  %952 = vmatpush.msrb.mxu3 %v741_v20  ;;  %v374_v13 = vld [vmem:[%s2015_s6 + $0x350] sm:$0xff] }
  0x9c   : > { %893 = vmatpush.msrb.mxu0 %v349_v21  ;;  %912 = vmatpush.msrb.mxu1 %v485_v22  ;;  %v510_v15 = vld [vmem:[%s2015_s6 + $0x790] sm:$0xff] }
  0x9d   : > { %934 = vmatpush.msrb.mxu2 %v597_v23  ;;  %953 = vmatpush.msrb.mxu3 %v733_v24  ;;  %v758_v16 = vld [vmem:[%s2015_s6 + $0xf50] sm:$0xff] }
  0x9e   : > { %894 = vmatpush.msrb.mxu0 %v341_v25  ;;  %913 = vmatpush.msrb.mxu1 %v477_v26  ;;  %v366_v17 = vld [vmem:[%s2015_s6 + $0x310] sm:$0xff] }
  0x9f   : > { %935 = vmatpush.msrb.mxu2 %v589_v27  ;;  %954 = vmatpush.msrb.mxu3 %v725_v28  ;;  %v614_v18 = vld [vmem:[%s2015_s6 + $0xad0] sm:$0xff] }
  0xa0   : > { %895 = vmatpush.msrb.mxu0 %v333_v29  ;;  %914 = vmatpush.msrb.mxu1 %v469_v30  ;;  %v502_v19 = vld [vmem:[%s2015_s6 + $0x750] sm:$0xff] }
  0xa1   : > { %936 = vmatpush.msrb.mxu2 %v581_v31  ;;  %955 = vmatpush.msrb.mxu3 %v717_v32  ;;  %v750_v20 = vld [vmem:[%s2015_s6 + $0xf10] sm:$0xff] }
  0xa2   : > { %896 = vmatpush.msrb.mxu0 %v325_v33  ;;  %915 = vmatpush.msrb.mxu1 %v461_v34  ;;  %v358_v21 = vld [vmem:[%s2015_s6 + $0x2d0] sm:$0xff] }
  0xa3   : > { %937 = vmatpush.msrb.mxu2 %v573_v35  ;;  %956 = vmatpush.msrb.mxu3 %v709_v36  ;;  %v606_v22 = vld [vmem:[%s2015_s6 + $0xa90] sm:$0xff] }
  0xa4   : > { %897 = vmatpush.msrb.mxu0 %v317_v37  ;;  %916 = vmatpush.msrb.mxu1 %v453_v38  ;;  %v494_v23 = vld [vmem:[%s2015_s6 + $0x710] sm:$0xff] }
  0xa5   : > { %938 = vmatpush.msrb.mxu2 %v565_v39  ;;  %957 = vmatpush.msrb.mxu3 %v701_v40  ;;  %v742_v24 = vld [vmem:[%s2015_s6 + $0xed0] sm:$0xff] }
  0xa6   : > { %898 = vmatpush.msrb.mxu0 %v309_v41  ;;  %917 = vmatpush.msrb.mxu1 %v445_v42  ;;  %v350_v25 = vld [vmem:[%s2015_s6 + $0x290] sm:$0xff] }
  0xa7   : > { %939 = vmatpush.msrb.mxu2 %v557_v43  ;;  %958 = vmatpush.msrb.mxu3 %v693_v44  ;;  %v598_v26 = vld [vmem:[%s2015_s6 + $0xa50] sm:$0xff] }
  0xa8   : > { %899 = vmatpush.msrb.mxu0 %v301_v46  ;;  %918 = vmatpush.msrb.mxu1 %v437_v47  ;;  %v486_v27 = vld [vmem:[%s2015_s6 + $0x6d0] sm:$0xff] }
  0xa9   : > { %940 = vmatpush.msrb.mxu2 %v549_v48  ;;  %959 = vmatpush.msrb.mxu3 %v685_v49  ;;  %v734_v28 = vld [vmem:[%s2015_s6 + $0xe90] sm:$0xff] }
  0xaa   : > { %824 = vmatmul.f32.vlgmr.msra.gmra.mxu0 %v2136_v50  ;;  %884 = vmatmul.f32.vlgmr.msra.gmra.mxu3 %v2139_v51  ;;  %v342_v29 = vld [vmem:[%s2015_s6 + $0x250] sm:$0xff] }
  0xab   : > { %900 = vmatpush.msrb.mxu0 %v293_v52  ;;  %919 = vmatpush.msrb.mxu1 %v429_v53  ;;  %v590_v30 = vld [vmem:[%s2015_s6 + $0xa10] sm:$0xff] }
  0xac   : > { %941 = vmatpush.msrb.mxu2 %v541_v54  ;;  %960 = vmatpush.msrb.mxu3 %v677_v55  ;;  %v478_v31 = vld [vmem:[%s2015_s6 + $0x690] sm:$0xff] }
  0xad   : > { %844 = vmatmul.f32.vlgmr.msra.gmra.mxu1 %v2146_v56  ;;  %901 = vmatpush.msrb.mxu0 %v285_v57  ;;  %v726_v32 = vld [vmem:[%s2015_s6 + $0xe50] sm:$0xff] }
  0xae   : > { %920 = vmatpush.msrb.mxu1 %v421_v58  ;;  %942 = vmatpush.msrb.mxu2 %v533_v59  ;;  %v334_v33 = vld [vmem:[%s2015_s6 + $0x210] sm:$0xff] }
  0xaf   : > { %961 = vmatpush.msrb.mxu3 %v669_v60  ;;  %902 = vmatpush.msrb.mxu0 %v277_v61  ;;  %v582_v34 = vld [vmem:[%s2015_s6 + $0x9d0] sm:$0xff] }
  0xb0   : > { %921 = vmatpush.msrb.mxu1 %v413_v62  ;;  %943 = vmatpush.msrb.mxu2 %v525_v63  ;;  %v470_v35 = vld [vmem:[%s2015_s6 + $0x650] sm:$0xff] }
  0xb1   : > { %962 = vmatpush.msrb.mxu3 %v661_v0  ;;  %944 = vmatmul.f32.vlgmr.msrb.gmra.mxu2 %v2130_v45  ;;  %v718_v36 = vld [vmem:[%s2015_s6 + $0xe10] sm:$0xff] }
  0xb2   : > { %903 = vmatpush.msrb.mxu0 %v269_v1  ;;  %1008 = vmatpush.msra.mxu2 %v646_v2  ;;  %v326_v37 = vld [vmem:[%s2015_s6 + $0x1d0] sm:$0xff] }
  0xb3   : > { %922 = vmatpush.msrb.mxu1 %v405_v3  ;;  %963 = vmatpush.msrb.mxu3 %v653_v4  ;;  %v574_v38 = vld [vmem:[%s2015_s6 + $0x990] sm:$0xff] }
  0xb4   : > { %904 = vmatmul.f32.vlgmr.msrb.gmra.mxu0 %v2136_v50  ;;  %964 = vmatmul.f32.vlgmr.msrb.gmra.mxu3 %v2139_v51  ;;  %v462_v39 = vld [vmem:[%s2015_s6 + $0x610] sm:$0xff] }
  0xb5   : > { %968 = vmatpush.msra.mxu0 %v390_v5  ;;  %1009 = vmatpush.msra.mxu2 %v638_v6  ;;  %v710_v40 = vld [vmem:[%s2015_s6 + $0xdd0] sm:$0xff]  ;;  %v647_v5 = vld [vmem:[%s2015_s6 + $0xbd8] sm:$0xff] }
  0xb6   : > { %1028 = vmatpush.msra.mxu3 %v774_v7  ;;  %923 = vmatpush.msrb.mxu1 %v397_v8  ;;  %v318_v41 = vld [vmem:[%s2015_s6 + $0x190] sm:$0xff] }
  0xb7   : > { %969 = vmatpush.msra.mxu0 %v382_v9  ;;  %924 = vmatmul.f32.vlgmr.msrb.gmra.mxu1 %v2146_v56  ;;  %v566_v42 = vld [vmem:[%s2015_s6 + $0x950] sm:$0xff]  ;;  %v391_v9 = vld [vmem:[%s2015_s6 + $0x3d8] sm:$0xff] }
  0xb8   : > { %1010 = vmatpush.msra.mxu2 %v630_v10  ;;  %988 = vmatpush.msra.mxu1 %v518_v11  ;;  %v454_v43 = vld [vmem:[%s2015_s6 + $0x5d0] sm:$0xff]  ;;  %v639_v10 = vld [vmem:[%s2015_s6 + $0xb98] sm:$0xff] }
  0xb9   : > { %1029 = vmatpush.msra.mxu3 %v766_v12  ;;  %970 = vmatpush.msra.mxu0 %v374_v13  ;;  %v702_v44 = vld [vmem:[%s2015_s6 + $0xd90] sm:$0xff]  ;;  %v775_v11 = vld [vmem:[%s2015_s6 + $0xfd8] sm:$0xff] }
  0xba   : > { %1011 = vmatpush.msra.mxu2 %v622_v14  ;;  %989 = vmatpush.msra.mxu1 %v510_v15  ;;  %v310_v46 = vld [vmem:[%s2015_s6 + $0x150] sm:$0xff]  ;;  %v383_v13 = vld [vmem:[%s2015_s6 + $0x398] sm:$0xff] }
  0xbb   : > { %1030 = vmatpush.msra.mxu3 %v758_v16  ;;  %971 = vmatpush.msra.mxu0 %v366_v17  ;;  %v558_v47 = vld [vmem:[%s2015_s6 + $0x910] sm:$0xff]  ;;  %v519_v14 = vld [vmem:[%s2015_s6 + $0x7d8] sm:$0xff] }
  0xbc   : > { %1012 = vmatpush.msra.mxu2 %v614_v18  ;;  %990 = vmatpush.msra.mxu1 %v502_v19  ;;  %v446_v48 = vld [vmem:[%s2015_s6 + $0x590] sm:$0xff]  ;;  %v631_v15 = vld [vmem:[%s2015_s6 + $0xb58] sm:$0xff] }
  0xbd   : > { %1031 = vmatpush.msra.mxu3 %v750_v20  ;;  %972 = vmatpush.msra.mxu0 %v358_v21  ;;  %v694_v49 = vld [vmem:[%s2015_s6 + $0xd50] sm:$0xff]  ;;  %v767_v16 = vld [vmem:[%s2015_s6 + $0xf98] sm:$0xff] }
  0xbe   : > { %1013 = vmatpush.msra.mxu2 %v606_v22  ;;  %991 = vmatpush.msra.mxu1 %v494_v23  ;;  %v302_v52 = vld [vmem:[%s2015_s6 + $0x110] sm:$0xff]  ;;  %v375_v17 = vld [vmem:[%s2015_s6 + $0x358] sm:$0xff] }
  0xbf   : > { %1032 = vmatpush.msra.mxu3 %v742_v24  ;;  %973 = vmatpush.msra.mxu0 %v350_v25  ;;  %v550_v53 = vld [vmem:[%s2015_s6 + $0x8d0] sm:$0xff]  ;;  %v511_v18 = vld [vmem:[%s2015_s6 + $0x798] sm:$0xff] }
  0xc0   : > { %1014 = vmatpush.msra.mxu2 %v598_v26  ;;  %992 = vmatpush.msra.mxu1 %v486_v27  ;;  %v438_v54 = vld [vmem:[%s2015_s6 + $0x550] sm:$0xff]  ;;  %v623_v19 = vld [vmem:[%s2015_s6 + $0xb18] sm:$0xff] }
  0xc1   : > { %1033 = vmatpush.msra.mxu3 %v734_v28  ;;  %974 = vmatpush.msra.mxu0 %v342_v29  ;;  %v686_v55 = vld [vmem:[%s2015_s6 + $0xd10] sm:$0xff]  ;;  %v759_v20 = vld [vmem:[%s2015_s6 + $0xf58] sm:$0xff] }
  0xc2   : > { %1015 = vmatpush.msra.mxu2 %v590_v30  ;;  %993 = vmatpush.msra.mxu1 %v478_v31  ;;  %v294_v57 = vld [vmem:[%s2015_s6 + $0xd0] sm:$0xff]  ;;  %v367_v21 = vld [vmem:[%s2015_s6 + $0x318] sm:$0xff] }
  0xc3   : > { %1034 = vmatpush.msra.mxu3 %v726_v32  ;;  %975 = vmatpush.msra.mxu0 %v334_v33  ;;  %v542_v58 = vld [vmem:[%s2015_s6 + $0x890] sm:$0xff]  ;;  %v503_v22 = vld [vmem:[%s2015_s6 + $0x758] sm:$0xff] }
  0xc4   : > { %1016 = vmatpush.msra.mxu2 %v582_v34  ;;  %994 = vmatpush.msra.mxu1 %v470_v35  ;;  %v430_v59 = vld [vmem:[%s2015_s6 + $0x510] sm:$0xff]  ;;  %v615_v23 = vld [vmem:[%s2015_s6 + $0xad8] sm:$0xff] }
  0xc5   : > { %1035 = vmatpush.msra.mxu3 %v718_v36  ;;  %976 = vmatpush.msra.mxu0 %v326_v37  ;;  %v678_v60 = vld [vmem:[%s2015_s6 + $0xcd0] sm:$0xff]  ;;  %v751_v24 = vld [vmem:[%s2015_s6 + $0xf18] sm:$0xff] }
  0xc6   : > { %1017 = vmatpush.msra.mxu2 %v574_v38  ;;  %995 = vmatpush.msra.mxu1 %v462_v39  ;;  %v286_v61 = vld [vmem:[%s2015_s6 + $0x90] sm:$0xff]  ;;  %v359_v25 = vld [vmem:[%s2015_s6 + $0x2d8] sm:$0xff] }
  0xc7   : > { %1036 = vmatpush.msra.mxu3 %v710_v40  ;;  %977 = vmatpush.msra.mxu0 %v318_v41  ;;  %v534_v62 = vld [vmem:[%s2015_s6 + $0x850] sm:$0xff]  ;;  %v495_v26 = vld [vmem:[%s2015_s6 + $0x718] sm:$0xff] }
  0xc8   : > { %1018 = vmatpush.msra.mxu2 %v566_v42  ;;  %996 = vmatpush.msra.mxu1 %v454_v43  ;;  %v422_v63 = vld [vmem:[%s2015_s6 + $0x4d0] sm:$0xff]  ;;  %v607_v27 = vld [vmem:[%s2015_s6 + $0xa98] sm:$0xff] }
  0xc9   : > { %1037 = vmatpush.msra.mxu3 %v702_v44  ;;  %978 = vmatpush.msra.mxu0 %v310_v46  ;;  %v670_v0 = vld [vmem:[%s2015_s6 + $0xc90] sm:$0xff]  ;;  %v743_v28 = vld [vmem:[%s2015_s6 + $0xed8] sm:$0xff] }
  0xca   : > { %1019 = vmatpush.msra.mxu2 %v558_v47  ;;  %997 = vmatpush.msra.mxu1 %v446_v48  ;;  %v278_v1 = vld [vmem:[%s2015_s6 + $0x50] sm:$0xff]  ;;  %v351_v29 = vld [vmem:[%s2015_s6 + $0x298] sm:$0xff] }
  0xcb   : > { %1038 = vmatpush.msra.mxu3 %v694_v49  ;;  %979 = vmatpush.msra.mxu0 %v302_v52  ;;  %v526_v2 = vld [vmem:[%s2015_s6 + $0x810] sm:$0xff]  ;;  %v487_v30 = vld [vmem:[%s2015_s6 + $0x6d8] sm:$0xff] }
  0xcc   : > { %1020 = vmatpush.msra.mxu2 %v550_v53  ;;  %998 = vmatpush.msra.mxu1 %v438_v54  ;;  %v414_v3 = vld [vmem:[%s2015_s6 + $0x490] sm:$0xff]  ;;  %v599_v31 = vld [vmem:[%s2015_s6 + $0xa58] sm:$0xff] }
  0xcd   : > { %1039 = vmatpush.msra.mxu3 %v686_v55  ;;  %980 = vmatpush.msra.mxu0 %v294_v57  ;;  %v662_v4 = vld [vmem:[%s2015_s6 + $0xc50] sm:$0xff]  ;;  %v735_v32 = vld [vmem:[%s2015_s6 + $0xe98] sm:$0xff] }
  0xce   : > { %1021 = vmatpush.msra.mxu2 %v542_v58  ;;  %999 = vmatpush.msra.mxu1 %v430_v59  ;;  %v270_v6 = vld [vmem:[%s2015_s6 + $0x10] sm:$0xff]  ;;  %v343_v33 = vld [vmem:[%s2015_s6 + $0x258] sm:$0xff] }
  0xcf   : > { %1040 = vmatpush.msra.mxu3 %v678_v60  ;;  %981 = vmatpush.msra.mxu0 %v286_v61  ;;  %v406_v7 = vld [vmem:[%s2015_s6 + $0x450] sm:$0xff]  ;;  %v479_v34 = vld [vmem:[%s2015_s6 + $0x698] sm:$0xff] }
  0xd0   : > { %1022 = vmatpush.msra.mxu2 %v534_v62  ;;  %1000 = vmatpush.msra.mxu1 %v422_v63  ;;  %v654_v8 = vld [vmem:[%s2015_s6 + $0xc10] sm:$0xff]  ;;  %v591_v35 = vld [vmem:[%s2015_s6 + $0xa18] sm:$0xff] }
  0xd1   : > { %1041 = vmatpush.msra.mxu3 %v670_v0  ;;  %982 = vmatpush.msra.mxu0 %v278_v1  ;;  %v398_v12 = vld [vmem:[%s2015_s6 + $0x410] sm:$0xff]  ;;  %v727_v36 = vld [vmem:[%s2015_s6 + $0xe58] sm:$0xff] }
  0xd2   : > { %1023 = vmatpush.msra.mxu2 %v526_v2  ;;  %1001 = vmatpush.msra.mxu1 %v414_v3  ;;  %v335_v37 = vld [vmem:[%s2015_s6 + $0x218] sm:$0xff] }
  0xd3   : > { %1042 = vmatpush.msra.mxu3 %v662_v4  ;;  %983 = vmatpush.msra.mxu0 %v270_v6  ;;  %v471_v38 = vld [vmem:[%s2015_s6 + $0x658] sm:$0xff] }
  0xd4   : > { %1088 = vmatpush.msrb.mxu2 %v647_v5  ;;  %1002 = vmatpush.msra.mxu1 %v406_v7  ;;  %v583_v39 = vld [vmem:[%s2015_s6 + $0x9d8] sm:$0xff] }
  0xd5   : > { %1043 = vmatpush.msra.mxu3 %v654_v8  ;;  %1048 = vmatpush.msrb.mxu0 %v391_v9  ;;  %v719_v40 = vld [vmem:[%s2015_s6 + $0xe18] sm:$0xff] }
  0xd6   : > { %1089 = vmatpush.msrb.mxu2 %v639_v10  ;;  %1003 = vmatpush.msra.mxu1 %v398_v12  ;;  %v327_v41 = vld [vmem:[%s2015_s6 + $0x1d8] sm:$0xff]  ;;  %v648_v10 = vld [vmem:[%s2015_s6 + $0xbe0] sm:$0xff] }
  0xd7   : > { %1108 = vmatpush.msrb.mxu3 %v775_v11  ;;  %1049 = vmatpush.msrb.mxu0 %v383_v13  ;;  %v463_v42 = vld [vmem:[%s2015_s6 + $0x618] sm:$0xff]  ;;  %v392_v13 = vld [vmem:[%s2015_s6 + $0x3e0] sm:$0xff] }
  0xd8   : > { %1068 = vmatpush.msrb.mxu1 %v519_v14  ;;  %1090 = vmatpush.msrb.mxu2 %v631_v15  ;;  %v575_v43 = vld [vmem:[%s2015_s6 + $0x998] sm:$0xff]  ;;  %v640_v14 = vld [vmem:[%s2015_s6 + $0xba0] sm:$0xff] }
  0xd9   : > { %1109 = vmatpush.msrb.mxu3 %v767_v16  ;;  %1050 = vmatpush.msrb.mxu0 %v375_v17  ;;  %v711_v44 = vld [vmem:[%s2015_s6 + $0xdd8] sm:$0xff]  ;;  %v776_v15 = vld [vmem:[%s2015_s6 + $0xfe0] sm:$0xff] }
  0xda   : > { %1069 = vmatpush.msrb.mxu1 %v511_v18  ;;  %1091 = vmatpush.msrb.mxu2 %v623_v19  ;;  %v319_v46 = vld [vmem:[%s2015_s6 + $0x198] sm:$0xff]  ;;  %v384_v17 = vld [vmem:[%s2015_s6 + $0x3a0] sm:$0xff] }
  0xdb   : > { %1110 = vmatpush.msrb.mxu3 %v759_v20  ;;  %1051 = vmatpush.msrb.mxu0 %v367_v21  ;;  %v455_v47 = vld [vmem:[%s2015_s6 + $0x5d8] sm:$0xff]  ;;  %v520_v18 = vld [vmem:[%s2015_s6 + $0x7e0] sm:$0xff] }
  0xdc   : > { %1070 = vmatpush.msrb.mxu1 %v503_v22  ;;  %1092 = vmatpush.msrb.mxu2 %v615_v23  ;;  %v567_v48 = vld [vmem:[%s2015_s6 + $0x958] sm:$0xff]  ;;  %v768_v19 = vld [vmem:[%s2015_s6 + $0xfa0] sm:$0xff] }
  0xdd   : > { %1111 = vmatpush.msrb.mxu3 %v751_v24  ;;  %1052 = vmatpush.msrb.mxu0 %v359_v25  ;;  %v703_v49 = vld [vmem:[%s2015_s6 + $0xd98] sm:$0xff]  ;;  %v376_v20 = vld [vmem:[%s2015_s6 + $0x360] sm:$0xff] }
  0xde   : > { %1071 = vmatpush.msrb.mxu1 %v495_v26  ;;  %1093 = vmatpush.msrb.mxu2 %v607_v27  ;;  %v311_v52 = vld [vmem:[%s2015_s6 + $0x158] sm:$0xff]  ;;  %v760_v21 = vld [vmem:[%s2015_s6 + $0xf60] sm:$0xff] }
  0xdf   : > { %1112 = vmatpush.msrb.mxu3 %v743_v28  ;;  %1053 = vmatpush.msrb.mxu0 %v351_v29  ;;  %v447_v53 = vld [vmem:[%s2015_s6 + $0x598] sm:$0xff]  ;;  %v368_v22 = vld [vmem:[%s2015_s6 + $0x320] sm:$0xff] }
  0xe0   : > { %1072 = vmatpush.msrb.mxu1 %v487_v30  ;;  %1094 = vmatpush.msrb.mxu2 %v599_v31  ;;  %v559_v54 = vld [vmem:[%s2015_s6 + $0x918] sm:$0xff]  ;;  %v616_v23 = vld [vmem:[%s2015_s6 + $0xae0] sm:$0xff] }
  0xe1   : > { %1113 = vmatpush.msrb.mxu3 %v735_v32  ;;  %1054 = vmatpush.msrb.mxu0 %v343_v33  ;;  %v695_v55 = vld [vmem:[%s2015_s6 + $0xd58] sm:$0xff]  ;;  %v504_v24 = vld [vmem:[%s2015_s6 + $0x760] sm:$0xff] }
  0xe2   : > { %1073 = vmatpush.msrb.mxu1 %v479_v34  ;;  %1095 = vmatpush.msrb.mxu2 %v591_v35  ;;  %v303_v57 = vld [vmem:[%s2015_s6 + $0x118] sm:$0xff]  ;;  %v752_v25 = vld [vmem:[%s2015_s6 + $0xf20] sm:$0xff] }
  0xe3   : > { %1114 = vmatpush.msrb.mxu3 %v727_v36  ;;  %1055 = vmatpush.msrb.mxu0 %v335_v37  ;;  %v439_v58 = vld [vmem:[%s2015_s6 + $0x558] sm:$0xff]  ;;  %v608_v26 = vld [vmem:[%s2015_s6 + $0xaa0] sm:$0xff] }
  0xe4   : > { %1074 = vmatpush.msrb.mxu1 %v471_v38  ;;  %1096 = vmatpush.msrb.mxu2 %v583_v39  ;;  %v551_v59 = vld [vmem:[%s2015_s6 + $0x8d8] sm:$0xff]  ;;  %v496_v27 = vld [vmem:[%s2015_s6 + $0x720] sm:$0xff] }
  0xe5   : > { %1115 = vmatpush.msrb.mxu3 %v719_v40  ;;  %1056 = vmatpush.msrb.mxu0 %v327_v41  ;;  %v687_v60 = vld [vmem:[%s2015_s6 + $0xd18] sm:$0xff]  ;;  %v744_v28 = vld [vmem:[%s2015_s6 + $0xee0] sm:$0xff] }
  0xe6   : > { %1075 = vmatpush.msrb.mxu1 %v463_v42  ;;  %1097 = vmatpush.msrb.mxu2 %v575_v43  ;;  %v295_v61 = vld [vmem:[%s2015_s6 + $0xd8] sm:$0xff]  ;;  %v352_v29 = vld [vmem:[%s2015_s6 + $0x2a0] sm:$0xff] }
  0xe7   : > { %1116 = vmatpush.msrb.mxu3 %v711_v44  ;;  %1057 = vmatpush.msrb.mxu0 %v319_v46  ;;  %v431_v62 = vld [vmem:[%s2015_s6 + $0x518] sm:$0xff]  ;;  %v600_v30 = vld [vmem:[%s2015_s6 + $0xa60] sm:$0xff] }
  0xe8   : > { %1076 = vmatpush.msrb.mxu1 %v455_v47  ;;  %1098 = vmatpush.msrb.mxu2 %v567_v48  ;;  %v543_v63 = vld [vmem:[%s2015_s6 + $0x898] sm:$0xff]  ;;  %v488_v31 = vld [vmem:[%s2015_s6 + $0x6e0] sm:$0xff] }
  0xe9   : > { %1117 = vmatpush.msrb.mxu3 %v703_v49  ;;  %1058 = vmatpush.msrb.mxu0 %v311_v52  ;;  %v679_v0 = vld [vmem:[%s2015_s6 + $0xcd8] sm:$0xff]  ;;  %v736_v32 = vld [vmem:[%s2015_s6 + $0xea0] sm:$0xff] }
  0xea   : > { %1077 = vmatpush.msrb.mxu1 %v447_v53  ;;  %1099 = vmatpush.msrb.mxu2 %v559_v54  ;;  %v287_v1 = vld [vmem:[%s2015_s6 + $0x98] sm:$0xff]  ;;  %v344_v33 = vld [vmem:[%s2015_s6 + $0x260] sm:$0xff] }
  0xeb   : > { %1118 = vmatpush.msrb.mxu3 %v695_v55  ;;  %1024 = vmatmul.f32.vlgmr.msra.gmra.mxu2 %v2130_v45  ;;  %v423_v2 = vld [vmem:[%s2015_s6 + $0x4d8] sm:$0xff]  ;;  %v592_v34 = vld [vmem:[%s2015_s6 + $0xa20] sm:$0xff] }
  0xec   : > { %1059 = vmatpush.msrb.mxu0 %v303_v57  ;;  %1078 = vmatpush.msrb.mxu1 %v439_v58  ;;  %v535_v3 = vld [vmem:[%s2015_s6 + $0x858] sm:$0xff]  ;;  %v480_v35 = vld [vmem:[%s2015_s6 + $0x6a0] sm:$0xff] }
  0xed   : > { %1100 = vmatpush.msrb.mxu2 %v551_v59  ;;  %1119 = vmatpush.msrb.mxu3 %v687_v60  ;;  %v671_v4 = vld [vmem:[%s2015_s6 + $0xc98] sm:$0xff]  ;;  %v728_v36 = vld [vmem:[%s2015_s6 + $0xe60] sm:$0xff] }
  0xee   : > { %984 = vmatmul.f32.vlgmr.msra.gmra.mxu0 %v2136_v50  ;;  %1044 = vmatmul.f32.vlgmr.msra.gmra.mxu3 %v2139_v51  ;;  %v279_v5 = vld [vmem:[%s2015_s6 + $0x58] sm:$0xff]  ;;  %v336_v37 = vld [vmem:[%s2015_s6 + $0x220] sm:$0xff] }
  0xef   : > { %1060 = vmatpush.msrb.mxu0 %v295_v61  ;;  %1079 = vmatpush.msrb.mxu1 %v431_v62  ;;  %v415_v6 = vld [vmem:[%s2015_s6 + $0x498] sm:$0xff]  ;;  %v584_v38 = vld [vmem:[%s2015_s6 + $0x9e0] sm:$0xff] }
  0xf0   : > { %1101 = vmatpush.msrb.mxu2 %v543_v63  ;;  %1120 = vmatpush.msrb.mxu3 %v679_v0  ;;  %v527_v7 = vld [vmem:[%s2015_s6 + $0x818] sm:$0xff]  ;;  %v472_v39 = vld [vmem:[%s2015_s6 + $0x660] sm:$0xff] }
  0xf1   : > { %1004 = vmatmul.f32.vlgmr.msra.gmra.mxu1 %v2146_v56  ;;  %1061 = vmatpush.msrb.mxu0 %v287_v1  ;;  %v663_v8 = vld [vmem:[%s2015_s6 + $0xc58] sm:$0xff]  ;;  %v720_v40 = vld [vmem:[%s2015_s6 + $0xe20] sm:$0xff] }
  0xf2   : > { %1080 = vmatpush.msrb.mxu1 %v423_v2  ;;  %1102 = vmatpush.msrb.mxu2 %v535_v3  ;;  %v271_v9 = vld [vmem:[%s2015_s6 + $0x18] sm:$0xff]  ;;  %v328_v41 = vld [vmem:[%s2015_s6 + $0x1e0] sm:$0xff] }
  0xf3   : > { %1121 = vmatpush.msrb.mxu3 %v671_v4  ;;  %1062 = vmatpush.msrb.mxu0 %v279_v5  ;;  %v407_v11 = vld [vmem:[%s2015_s6 + $0x458] sm:$0xff]  ;;  %v576_v42 = vld [vmem:[%s2015_s6 + $0x9a0] sm:$0xff] }
  0xf4   : > { %1081 = vmatpush.msrb.mxu1 %v415_v6  ;;  %1103 = vmatpush.msrb.mxu2 %v527_v7  ;;  %v655_v12 = vld [vmem:[%s2015_s6 + $0xc18] sm:$0xff]  ;;  %v464_v43 = vld [vmem:[%s2015_s6 + $0x620] sm:$0xff] }
  0xf5   : > { %1122 = vmatpush.msrb.mxu3 %v663_v8  ;;  %1104 = vmatmul.f32.vlgmr.msrb.gmra.mxu2 %v2130_v45  ;;  %v399_v16 = vld [vmem:[%s2015_s6 + $0x418] sm:$0xff]  ;;  %v632_v45 = vld [vmem:[%s2015_s6 + $0xb60] sm:$0xff] }
  0xf6   : > { %1063 = vmatpush.msrb.mxu0 %v271_v9  ;;  %1168 = vmatpush.msra.mxu2 %v648_v10  ;;  %v712_v44 = vld [vmem:[%s2015_s6 + $0xde0] sm:$0xff]  ;;  %v649_v9 = vld [vmem:[%s2015_s6 + $0xbe8] sm:$0xff] }
  0xf7   : > { %1082 = vmatpush.msrb.mxu1 %v407_v11  ;;  %1123 = vmatpush.msrb.mxu3 %v655_v12  ;;  %v320_v46 = vld [vmem:[%s2015_s6 + $0x1a0] sm:$0xff] }
  0xf8   : > { %1064 = vmatmul.f32.vlgmr.msrb.gmra.mxu0 %v2136_v50  ;;  %1124 = vmatmul.f32.vlgmr.msrb.gmra.mxu3 %v2139_v51  ;;  %v624_v50 = vld [vmem:[%s2015_s6 + $0xb20] sm:$0xff] }
  0xf9   : > { %1128 = vmatpush.msra.mxu0 %v392_v13  ;;  %1169 = vmatpush.msra.mxu2 %v640_v14  ;;  %v512_v51 = vld [vmem:[%s2015_s6 + $0x7a0] sm:$0xff]  ;;  %v393_v13 = vld [vmem:[%s2015_s6 + $0x3e8] sm:$0xff] }
  0xfa   : > { %1188 = vmatpush.msra.mxu3 %v776_v15  ;;  %1083 = vmatpush.msrb.mxu1 %v399_v16  ;;  %v568_v47 = vld [vmem:[%s2015_s6 + $0x960] sm:$0xff]  ;;  %v641_v14 = vld [vmem:[%s2015_s6 + $0xba8] sm:$0xff] }
  0xfb   : > { %1129 = vmatpush.msra.mxu0 %v384_v17  ;;  %1084 = vmatmul.f32.vlgmr.msrb.gmra.mxu1 %v2146_v56  ;;  %v360_v56 = vld [vmem:[%s2015_s6 + $0x2e0] sm:$0xff]  ;;  %v777_v15 = vld [vmem:[%s2015_s6 + $0xfe8] sm:$0xff] }
  0xfc   : > { %1170 = vmatpush.msra.mxu2 %v632_v45  ;;  %1148 = vmatpush.msra.mxu1 %v520_v18  ;;  %v456_v48 = vld [vmem:[%s2015_s6 + $0x5e0] sm:$0xff]  ;;  %v385_v17 = vld [vmem:[%s2015_s6 + $0x3a8] sm:$0xff] }
  0xfd   : > { %1189 = vmatpush.msra.mxu3 %v768_v19  ;;  %1130 = vmatpush.msra.mxu0 %v376_v20  ;;  %v704_v49 = vld [vmem:[%s2015_s6 + $0xda0] sm:$0xff]  ;;  %v521_v45 = vld [vmem:[%s2015_s6 + $0x7e8] sm:$0xff] }
  0xfe   : > { %1171 = vmatpush.msra.mxu2 %v624_v50  ;;  %1149 = vmatpush.msra.mxu1 %v512_v51  ;;  %v312_v52 = vld [vmem:[%s2015_s6 + $0x160] sm:$0xff]  ;;  %v633_v18 = vld [vmem:[%s2015_s6 + $0xb68] sm:$0xff] }
  0xff   : > { %1190 = vmatpush.msra.mxu3 %v760_v21  ;;  %1131 = vmatpush.msra.mxu0 %v368_v22  ;;  %v560_v53 = vld [vmem:[%s2015_s6 + $0x920] sm:$0xff]  ;;  %v769_v19 = vld [vmem:[%s2015_s6 + $0xfa8] sm:$0xff] }
 0x100   : > { %1172 = vmatpush.msra.mxu2 %v616_v23  ;;  %1150 = vmatpush.msra.mxu1 %v504_v24  ;;  %v448_v54 = vld [vmem:[%s2015_s6 + $0x5a0] sm:$0xff]  ;;  %v377_v20 = vld [vmem:[%s2015_s6 + $0x368] sm:$0xff] }
 0x101   : > { %1191 = vmatpush.msra.mxu3 %v752_v25  ;;  %1132 = vmatpush.msra.mxu0 %v360_v56  ;;  %v696_v55 = vld [vmem:[%s2015_s6 + $0xd60] sm:$0xff]  ;;  %v513_v50 = vld [vmem:[%s2015_s6 + $0x7a8] sm:$0xff] }
 0x102   : > { %1173 = vmatpush.msra.mxu2 %v608_v26  ;;  %1151 = vmatpush.msra.mxu1 %v496_v27  ;;  %v304_v57 = vld [vmem:[%s2015_s6 + $0x120] sm:$0xff]  ;;  %v625_v51 = vld [vmem:[%s2015_s6 + $0xb28] sm:$0xff] }
 0x103   : > { %1192 = vmatpush.msra.mxu3 %v744_v28  ;;  %1133 = vmatpush.msra.mxu0 %v352_v29  ;;  %v552_v58 = vld [vmem:[%s2015_s6 + $0x8e0] sm:$0xff]  ;;  %v761_v21 = vld [vmem:[%s2015_s6 + $0xf68] sm:$0xff] }
 0x104   : > { %1174 = vmatpush.msra.mxu2 %v600_v30  ;;  %1152 = vmatpush.msra.mxu1 %v488_v31  ;;  %v440_v59 = vld [vmem:[%s2015_s6 + $0x560] sm:$0xff]  ;;  %v369_v22 = vld [vmem:[%s2015_s6 + $0x328] sm:$0xff] }
 0x105   : > { %1193 = vmatpush.msra.mxu3 %v736_v32  ;;  %1134 = vmatpush.msra.mxu0 %v344_v33  ;;  %v688_v60 = vld [vmem:[%s2015_s6 + $0xd20] sm:$0xff]  ;;  %v505_v23 = vld [vmem:[%s2015_s6 + $0x768] sm:$0xff] }
 0x106   : > { %1175 = vmatpush.msra.mxu2 %v592_v34  ;;  %1153 = vmatpush.msra.mxu1 %v480_v35  ;;  %v296_v61 = vld [vmem:[%s2015_s6 + $0xe0] sm:$0xff]  ;;  %v617_v24 = vld [vmem:[%s2015_s6 + $0xae8] sm:$0xff] }
 0x107   : > { %1194 = vmatpush.msra.mxu3 %v728_v36  ;;  %1135 = vmatpush.msra.mxu0 %v336_v37  ;;  %v544_v62 = vld [vmem:[%s2015_s6 + $0x8a0] sm:$0xff]  ;;  %v753_v25 = vld [vmem:[%s2015_s6 + $0xf28] sm:$0xff] }
 0x108   : > { %1176 = vmatpush.msra.mxu2 %v584_v38  ;;  %1154 = vmatpush.msra.mxu1 %v472_v39  ;;  %v432_v63 = vld [vmem:[%s2015_s6 + $0x520] sm:$0xff]  ;;  %v361_v56 = vld [vmem:[%s2015_s6 + $0x2e8] sm:$0xff] }
 0x109   : > { %1195 = vmatpush.msra.mxu3 %v720_v40  ;;  %1136 = vmatpush.msra.mxu0 %v328_v41  ;;  %v680_v0 = vld [vmem:[%s2015_s6 + $0xce0] sm:$0xff]  ;;  %v497_v26 = vld [vmem:[%s2015_s6 + $0x728] sm:$0xff] }
 0x10a   : > { %1177 = vmatpush.msra.mxu2 %v576_v42  ;;  %1155 = vmatpush.msra.mxu1 %v464_v43  ;;  %v288_v1 = vld [vmem:[%s2015_s6 + $0xa0] sm:$0xff]  ;;  %v609_v27 = vld [vmem:[%s2015_s6 + $0xaa8] sm:$0xff] }
 0x10b   : > { %1196 = vmatpush.msra.mxu3 %v712_v44  ;;  %1137 = vmatpush.msra.mxu0 %v320_v46  ;;  %v536_v2 = vld [vmem:[%s2015_s6 + $0x860] sm:$0xff]  ;;  %v745_v28 = vld [vmem:[%s2015_s6 + $0xee8] sm:$0xff] }
 0x10c   : > { %1178 = vmatpush.msra.mxu2 %v568_v47  ;;  %1156 = vmatpush.msra.mxu1 %v456_v48  ;;  %v424_v3 = vld [vmem:[%s2015_s6 + $0x4e0] sm:$0xff]  ;;  %v353_v29 = vld [vmem:[%s2015_s6 + $0x2a8] sm:$0xff] }
 0x10d   : > { %1197 = vmatpush.msra.mxu3 %v704_v49  ;;  %1138 = vmatpush.msra.mxu0 %v312_v52  ;;  %v672_v4 = vld [vmem:[%s2015_s6 + $0xca0] sm:$0xff]  ;;  %v489_v30 = vld [vmem:[%s2015_s6 + $0x6e8] sm:$0xff] }
 0x10e   : > { %1179 = vmatpush.msra.mxu2 %v560_v53  ;;  %1157 = vmatpush.msra.mxu1 %v448_v54  ;;  %v280_v5 = vld [vmem:[%s2015_s6 + $0x60] sm:$0xff]  ;;  %v601_v31 = vld [vmem:[%s2015_s6 + $0xa68] sm:$0xff] }
 0x10f   : > { %1198 = vmatpush.msra.mxu3 %v696_v55  ;;  %1139 = vmatpush.msra.mxu0 %v304_v57  ;;  %v528_v6 = vld [vmem:[%s2015_s6 + $0x820] sm:$0xff]  ;;  %v737_v32 = vld [vmem:[%s2015_s6 + $0xea8] sm:$0xff] }
 0x110   : > { %1180 = vmatpush.msra.mxu2 %v552_v58  ;;  %1158 = vmatpush.msra.mxu1 %v440_v59  ;;  %v416_v7 = vld [vmem:[%s2015_s6 + $0x4a0] sm:$0xff]  ;;  %v345_v33 = vld [vmem:[%s2015_s6 + $0x268] sm:$0xff] }
 0x111   : > { %1199 = vmatpush.msra.mxu3 %v688_v60  ;;  %1140 = vmatpush.msra.mxu0 %v296_v61  ;;  %v664_v8 = vld [vmem:[%s2015_s6 + $0xc60] sm:$0xff]  ;;  %v481_v34 = vld [vmem:[%s2015_s6 + $0x6a8] sm:$0xff]  ;;  %v2414_v61 = vld.sshfl [vmem:[#allocation1 + $0x10] sm:$0xff pattern:$0x73625140] }
 0x112   : > { %1181 = vmatpush.msra.mxu2 %v544_v62  ;;  %1159 = vmatpush.msra.mxu1 %v432_v63  ;;  %v272_v10 = vld [vmem:[%s2015_s6 + $0x20] sm:$0xff]  ;;  %v593_v35 = vld [vmem:[%s2015_s6 + $0xa28] sm:$0xff] }
 0x113   : > { %1200 = vmatpush.msra.mxu3 %v680_v0  ;;  %1141 = vmatpush.msra.mxu0 %v288_v1  ;;  %v408_v11 = vld [vmem:[%s2015_s6 + $0x460] sm:$0xff]  ;;  %v729_v36 = vld [vmem:[%s2015_s6 + $0xe68] sm:$0xff] }
 0x114   : > { %1182 = vmatpush.msra.mxu2 %v536_v2  ;;  %1160 = vmatpush.msra.mxu1 %v424_v3  ;;  %v656_v12 = vld [vmem:[%s2015_s6 + $0xc20] sm:$0xff]  ;;  %v337_v37 = vld [vmem:[%s2015_s6 + $0x228] sm:$0xff] }
 0x115   : > { %1201 = vmatpush.msra.mxu3 %v672_v4  ;;  %1142 = vmatpush.msra.mxu0 %v280_v5  ;;  %v400_v16 = vld [vmem:[%s2015_s6 + $0x420] sm:$0xff]  ;;  %v473_v38 = vld [vmem:[%s2015_s6 + $0x668] sm:$0xff] }
 0x116   : > { %1183 = vmatpush.msra.mxu2 %v528_v6  ;;  %1161 = vmatpush.msra.mxu1 %v416_v7  ;;  %v585_v39 = vld [vmem:[%s2015_s6 + $0x9e8] sm:$0xff]  ;;  %v2424_v3 = vld.sshfl [vmem:[#allocation1 + $0x18] sm:$0xff pattern:$0x73625140] }
 0x117   : > { %1202 = vmatpush.msra.mxu3 %v664_v8  ;;  %1143 = vmatpush.msra.mxu0 %v272_v10  ;;  %v721_v40 = vld [vmem:[%s2015_s6 + $0xe28] sm:$0xff]  ;;  %v2431_v8 = vld.sshfl [vmem:[#allocation1 + $0x8] sm:$0xff pattern:$0x73625140] }
 0x118   : > { %1248 = vmatpush.msrb.mxu2 %v649_v9  ;;  %1162 = vmatpush.msra.mxu1 %v408_v11  ;;  %v329_v41 = vld [vmem:[%s2015_s6 + $0x1e8] sm:$0xff] }
 0x119   : > { %1203 = vmatpush.msra.mxu3 %v656_v12  ;;  %1208 = vmatpush.msrb.mxu0 %v393_v13  ;;  %v465_v42 = vld [vmem:[%s2015_s6 + $0x628] sm:$0xff] }
 0x11a   : > { %1249 = vmatpush.msrb.mxu2 %v641_v14  ;;  %1163 = vmatpush.msra.mxu1 %v400_v16  ;;  %v577_v43 = vld [vmem:[%s2015_s6 + $0x9a8] sm:$0xff]  ;;  %v650_v14 = vld [vmem:[%s2015_s6 + $0xbf0] sm:$0xff] }
 0x11b   : > { %1268 = vmatpush.msrb.mxu3 %v777_v15  ;;  %1209 = vmatpush.msrb.mxu0 %v385_v17  ;;  %v713_v44 = vld [vmem:[%s2015_s6 + $0xde8] sm:$0xff]  ;;  %v394_v17 = vld [vmem:[%s2015_s6 + $0x3f0] sm:$0xff] }
 0x11c   : > { %1228 = vmatpush.msrb.mxu1 %v521_v45  ;;  %1250 = vmatpush.msrb.mxu2 %v633_v18  ;;  %v321_v46 = vld [vmem:[%s2015_s6 + $0x1a8] sm:$0xff]  ;;  %v642_v45 = vld [vmem:[%s2015_s6 + $0xbb0] sm:$0xff] }
 0x11d   : > { %1269 = vmatpush.msrb.mxu3 %v769_v19  ;;  %1210 = vmatpush.msrb.mxu0 %v377_v20  ;;  %v457_v47 = vld [vmem:[%s2015_s6 + $0x5e8] sm:$0xff]  ;;  %v778_v18 = vld [vmem:[%s2015_s6 + $0xff0] sm:$0xff] }
 0x11e   : > { %1229 = vmatpush.msrb.mxu1 %v513_v50  ;;  %1251 = vmatpush.msrb.mxu2 %v625_v51  ;;  %v569_v48 = vld [vmem:[%s2015_s6 + $0x968] sm:$0xff]  ;;  %v386_v20 = vld [vmem:[%s2015_s6 + $0x3b0] sm:$0xff] }
 0x11f   : > { %1270 = vmatpush.msrb.mxu3 %v761_v21  ;;  %1211 = vmatpush.msrb.mxu0 %v369_v22  ;;  %v705_v49 = vld [vmem:[%s2015_s6 + $0xda8] sm:$0xff]  ;;  %v634_v50 = vld [vmem:[%s2015_s6 + $0xb70] sm:$0xff] }
 0x120   : > { %1230 = vmatpush.msrb.mxu1 %v505_v23  ;;  %1252 = vmatpush.msrb.mxu2 %v617_v24  ;;  %v313_v52 = vld [vmem:[%s2015_s6 + $0x168] sm:$0xff]  ;;  %v522_v51 = vld [vmem:[%s2015_s6 + $0x7f0] sm:$0xff] }
 0x121   : > { %1271 = vmatpush.msrb.mxu3 %v753_v25  ;;  %1212 = vmatpush.msrb.mxu0 %v361_v56  ;;  %v449_v53 = vld [vmem:[%s2015_s6 + $0x5a8] sm:$0xff]  ;;  %v770_v21 = vld [vmem:[%s2015_s6 + $0xfb0] sm:$0xff] }
 0x122   : > { %1231 = vmatpush.msrb.mxu1 %v497_v26  ;;  %1253 = vmatpush.msrb.mxu2 %v609_v27  ;;  %v561_v54 = vld [vmem:[%s2015_s6 + $0x928] sm:$0xff]  ;;  %v378_v22 = vld [vmem:[%s2015_s6 + $0x370] sm:$0xff] }
 0x123   : > { %1272 = vmatpush.msrb.mxu3 %v745_v28  ;;  %1213 = vmatpush.msrb.mxu0 %v353_v29  ;;  %v697_v55 = vld [vmem:[%s2015_s6 + $0xd68] sm:$0xff]  ;;  %v626_v23 = vld [vmem:[%s2015_s6 + $0xb30] sm:$0xff] }
 0x124   : > { %1232 = vmatpush.msrb.mxu1 %v489_v30  ;;  %1254 = vmatpush.msrb.mxu2 %v601_v31  ;;  %v305_v57 = vld [vmem:[%s2015_s6 + $0x128] sm:$0xff]  ;;  %v514_v24 = vld [vmem:[%s2015_s6 + $0x7b0] sm:$0xff] }
 0x125   : > { %1273 = vmatpush.msrb.mxu3 %v737_v32  ;;  %1214 = vmatpush.msrb.mxu0 %v345_v33  ;;  %v441_v58 = vld [vmem:[%s2015_s6 + $0x568] sm:$0xff]  ;;  %v762_v25 = vld [vmem:[%s2015_s6 + $0xf70] sm:$0xff] }
 0x126   : > { %1233 = vmatpush.msrb.mxu1 %v481_v34  ;;  %1255 = vmatpush.msrb.mxu2 %v593_v35  ;;  %v553_v59 = vld [vmem:[%s2015_s6 + $0x8e8] sm:$0xff]  ;;  %v370_v56 = vld [vmem:[%s2015_s6 + $0x330] sm:$0xff] }
 0x127   : > { %1274 = vmatpush.msrb.mxu3 %v729_v36  ;;  %1215 = vmatpush.msrb.mxu0 %v337_v37  ;;  %v689_v60 = vld [vmem:[%s2015_s6 + $0xd28] sm:$0xff]  ;;  %v618_v26 = vld [vmem:[%s2015_s6 + $0xaf0] sm:$0xff] }
 0x128   : > { %1234 = vmatpush.msrb.mxu1 %v473_v38  ;;  %1256 = vmatpush.msrb.mxu2 %v585_v39  ;;  %v297_v62 = vld [vmem:[%s2015_s6 + $0xe8] sm:$0xff]  ;;  %v506_v27 = vld [vmem:[%s2015_s6 + $0x770] sm:$0xff] }
 0x129   : > { %1275 = vmatpush.msrb.mxu3 %v721_v40  ;;  %1216 = vmatpush.msrb.mxu0 %v329_v41  ;;  %v433_v63 = vld [vmem:[%s2015_s6 + $0x528] sm:$0xff]  ;;  %v754_v28 = vld [vmem:[%s2015_s6 + $0xf30] sm:$0xff] }
 0x12a   : > { %1235 = vmatpush.msrb.mxu1 %v465_v42  ;;  %1257 = vmatpush.msrb.mxu2 %v577_v43  ;;  %v545_v0 = vld [vmem:[%s2015_s6 + $0x8a8] sm:$0xff]  ;;  %v362_v29 = vld [vmem:[%s2015_s6 + $0x2f0] sm:$0xff] }
 0x12b   : > { %1276 = vmatpush.msrb.mxu3 %v713_v44  ;;  %1217 = vmatpush.msrb.mxu0 %v321_v46  ;;  %v2420_v1 = vld.sshfl [vmem:[#allocation1] sm:$0xff pattern:$0x73625140]  ;;  %v610_v30 = vld [vmem:[%s2015_s6 + $0xab0] sm:$0xff] }
 0x12c   : > { %1236 = vmatpush.msrb.mxu1 %v457_v47  ;;  %1258 = vmatpush.msrb.mxu2 %v569_v48  ;;  %v681_v2 = vld [vmem:[%s2015_s6 + $0xce8] sm:$0xff]  ;;  %v498_v31 = vld [vmem:[%s2015_s6 + $0x730] sm:$0xff] }
 0x12d   : > { %1277 = vmatpush.msrb.mxu3 %v705_v49  ;;  %1218 = vmatpush.msrb.mxu0 %v313_v52  ;;  %v289_v4 = vld [vmem:[%s2015_s6 + $0xa8] sm:$0xff]  ;;  %v746_v32 = vld [vmem:[%s2015_s6 + $0xef0] sm:$0xff] }
 0x12e   : > { %1237 = vmatpush.msrb.mxu1 %v449_v53  ;;  %1259 = vmatpush.msrb.mxu2 %v561_v54  ;;  %v425_v5 = vld [vmem:[%s2015_s6 + $0x4e8] sm:$0xff]  ;;  %v354_v33 = vld [vmem:[%s2015_s6 + $0x2b0] sm:$0xff] }
 0x12f   : > { %1278 = vmatpush.msrb.mxu3 %v697_v55  ;;  %1184 = vmatmul.f32.vlgmr.msra.gmra.mxu2 %v2414_v61  ;;  %v537_v6 = vld [vmem:[%s2015_s6 + $0x868] sm:$0xff]  ;;  %v602_v34 = vld [vmem:[%s2015_s6 + $0xa70] sm:$0xff] }
 0x130   : > { %1219 = vmatpush.msrb.mxu0 %v305_v57  ;;  %1238 = vmatpush.msrb.mxu1 %v441_v58  ;;  %v673_v7 = vld [vmem:[%s2015_s6 + $0xca8] sm:$0xff]  ;;  %v490_v35 = vld [vmem:[%s2015_s6 + $0x6f0] sm:$0xff] }
 0x131   : > { %1260 = vmatpush.msrb.mxu2 %v553_v59  ;;  %1279 = vmatpush.msrb.mxu3 %v689_v60  ;;  %v281_v9 = vld [vmem:[%s2015_s6 + $0x68] sm:$0xff]  ;;  %v738_v36 = vld [vmem:[%s2015_s6 + $0xeb0] sm:$0xff] }
 0x132   : > { %1144 = vmatmul.f32.vlgmr.msra.gmra.mxu0 %v2420_v1  ;;  %1204 = vmatmul.f32.vlgmr.msra.gmra.mxu3 %v2424_v3  ;;  %v417_v10 = vld [vmem:[%s2015_s6 + $0x4a8] sm:$0xff]  ;;  %v346_v37 = vld [vmem:[%s2015_s6 + $0x270] sm:$0xff] }
 0x133   : > { %1220 = vmatpush.msrb.mxu0 %v297_v62  ;;  %1239 = vmatpush.msrb.mxu1 %v433_v63  ;;  %v529_v11 = vld [vmem:[%s2015_s6 + $0x828] sm:$0xff]  ;;  %v594_v38 = vld [vmem:[%s2015_s6 + $0xa30] sm:$0xff] }
 0x134   : > { %1261 = vmatpush.msrb.mxu2 %v545_v0  ;;  %1280 = vmatpush.msrb.mxu3 %v681_v2  ;;  %v665_v12 = vld [vmem:[%s2015_s6 + $0xc68] sm:$0xff]  ;;  %v482_v39 = vld [vmem:[%s2015_s6 + $0x6b0] sm:$0xff] }
 0x135   : > { %1164 = vmatmul.f32.vlgmr.msra.gmra.mxu1 %v2431_v8  ;;  %1221 = vmatpush.msrb.mxu0 %v289_v4  ;;  %v273_v13 = vld [vmem:[%s2015_s6 + $0x28] sm:$0xff]  ;;  %v730_v40 = vld [vmem:[%s2015_s6 + $0xe70] sm:$0xff] }
 0x136   : > { %1240 = vmatpush.msrb.mxu1 %v425_v5  ;;  %1262 = vmatpush.msrb.mxu2 %v537_v6  ;;  %v409_v15 = vld [vmem:[%s2015_s6 + $0x468] sm:$0xff]  ;;  %v338_v41 = vld [vmem:[%s2015_s6 + $0x230] sm:$0xff] }
 0x137   : > { %1281 = vmatpush.msrb.mxu3 %v673_v7  ;;  %1222 = vmatpush.msrb.mxu0 %v281_v9  ;;  %v657_v16 = vld [vmem:[%s2015_s6 + $0xc28] sm:$0xff]  ;;  %v586_v42 = vld [vmem:[%s2015_s6 + $0x9f0] sm:$0xff] }
 0x138   : > { %1241 = vmatpush.msrb.mxu1 %v417_v10  ;;  %1263 = vmatpush.msrb.mxu2 %v529_v11  ;;  %v401_v19 = vld [vmem:[%s2015_s6 + $0x428] sm:$0xff]  ;;  %v474_v43 = vld [vmem:[%s2015_s6 + $0x670] sm:$0xff] }
 0x139   : > { %1282 = vmatpush.msrb.mxu3 %v665_v12  ;;  %1264 = vmatmul.f32.vlgmr.msrb.gmra.mxu2 %v2414_v61  ;;  %v722_v44 = vld [vmem:[%s2015_s6 + $0xe30] sm:$0xff] }
 0x13a   : > { %1223 = vmatpush.msrb.mxu0 %v273_v13  ;;  %1328 = vmatpush.msra.mxu2 %v650_v14  ;;  %v330_v46 = vld [vmem:[%s2015_s6 + $0x1f0] sm:$0xff] }
 0x13b   : > { %1242 = vmatpush.msrb.mxu1 %v409_v15  ;;  %1283 = vmatpush.msrb.mxu3 %v657_v16  ;;  %v578_v47 = vld [vmem:[%s2015_s6 + $0x9b0] sm:$0xff] }
 0x13c   : > { %1224 = vmatmul.f32.vlgmr.msrb.gmra.mxu0 %v2420_v1  ;;  %1284 = vmatmul.f32.vlgmr.msrb.gmra.mxu3 %v2424_v3  ;;  %v466_v48 = vld [vmem:[%s2015_s6 + $0x630] sm:$0xff] }
 0x13d   : > { %1288 = vmatpush.msra.mxu0 %v394_v17  ;;  %1329 = vmatpush.msra.mxu2 %v642_v45  ;;  %v714_v49 = vld [vmem:[%s2015_s6 + $0xdf0] sm:$0xff]  ;;  %v2506_v17 = vpop.f32.mrf.mxu0  ;;  %v651_v45 = vld [vmem:[%s2015_s6 + $0xbf8] sm:$0xff] }
 0x13e   : > { %1348 = vmatpush.msra.mxu3 %v778_v18  ;;  %1243 = vmatpush.msrb.mxu1 %v401_v19  ;;  %v322_v52 = vld [vmem:[%s2015_s6 + $0x1b0] sm:$0xff] }
 0x13f   : > { %1289 = vmatpush.msra.mxu0 %v386_v20  ;;  %1244 = vmatmul.f32.vlgmr.msrb.gmra.mxu1 %v2431_v8  ;;  %v570_v53 = vld [vmem:[%s2015_s6 + $0x970] sm:$0xff] }
 0x140   : > { %1330 = vmatpush.msra.mxu2 %v634_v50  ;;  %1308 = vmatpush.msra.mxu1 %v522_v51  ;;  %v458_v54 = vld [vmem:[%s2015_s6 + $0x5f0] sm:$0xff]  ;;  %v395_v50 = vld [vmem:[%s2015_s6 + $0x3f8] sm:$0xff] }
 0x141   : > { %1349 = vmatpush.msra.mxu3 %v770_v21  ;;  %1290 = vmatpush.msra.mxu0 %v378_v22  ;;  %v706_v55 = vld [vmem:[%s2015_s6 + $0xdb0] sm:$0xff]  ;;  %v643_v51 = vld [vmem:[%s2015_s6 + $0xbb8] sm:$0xff] }
 0x142   : > { %1331 = vmatpush.msra.mxu2 %v626_v23  ;;  %1309 = vmatpush.msra.mxu1 %v514_v24  ;;  %v314_v57 = vld [vmem:[%s2015_s6 + $0x170] sm:$0xff]  ;;  %v779_v21 = vld [vmem:[%s2015_s6 + $0xff8] sm:$0xff]  ;;  %v2516_v23 = vpop.f32.mrf.mxu1  ;;  %v2518_v24 = vpop.f32.mrf.mxu2 }
 0x143   : > { %1350 = vmatpush.msra.mxu3 %v762_v25  ;;  %1291 = vmatpush.msra.mxu0 %v370_v56  ;;  %v562_v58 = vld [vmem:[%s2015_s6 + $0x930] sm:$0xff]  ;;  %v387_v25 = vld [vmem:[%s2015_s6 + $0x3b8] sm:$0xff] }
 0x144   : > { %1332 = vmatpush.msra.mxu2 %v618_v26  ;;  %1310 = vmatpush.msra.mxu1 %v506_v27  ;;  %v450_v59 = vld [vmem:[%s2015_s6 + $0x5b0] sm:$0xff]  ;;  %v523_v56 = vld [vmem:[%s2015_s6 + $0x7f8] sm:$0xff] }
 0x145   : > { %1351 = vmatpush.msra.mxu3 %v754_v28  ;;  %1292 = vmatpush.msra.mxu0 %v362_v29  ;;  %v698_v60 = vld [vmem:[%s2015_s6 + $0xd70] sm:$0xff]  ;;  %v635_v26 = vld [vmem:[%s2015_s6 + $0xb78] sm:$0xff] }
 0x146   : > { %1333 = vmatpush.msra.mxu2 %v610_v30  ;;  %1311 = vmatpush.msra.mxu1 %v498_v31  ;;  %v306_v62 = vld [vmem:[%s2015_s6 + $0x130] sm:$0xff]  ;;  %v771_v27 = vld [vmem:[%s2015_s6 + $0xfb8] sm:$0xff]  ;;  %v2526_v30 = vpop.f32.mrf.mxu3 }
 0x147   : > { %1352 = vmatpush.msra.mxu3 %v746_v32  ;;  %1293 = vmatpush.msra.mxu0 %v354_v33  ;;  %v554_v63 = vld [vmem:[%s2015_s6 + $0x8f0] sm:$0xff]  ;;  %v379_v28 = vld [vmem:[%s2015_s6 + $0x378] sm:$0xff] }
 0x148   : > { %1334 = vmatpush.msra.mxu2 %v602_v34  ;;  %1312 = vmatpush.msra.mxu1 %v490_v35  ;;  %v442_v0 = vld [vmem:[%s2015_s6 + $0x570] sm:$0xff]  ;;  %v515_v29 = vld [vmem:[%s2015_s6 + $0x7b8] sm:$0xff] }
 0x149   : > { %1353 = vmatpush.msra.mxu3 %v738_v36  ;;  %1294 = vmatpush.msra.mxu0 %v346_v37  ;;  %v690_v2 = vld [vmem:[%s2015_s6 + $0xd30] sm:$0xff]  ;;  %v627_v31 = vld [vmem:[%s2015_s6 + $0xb38] sm:$0xff]  ;;  %v905_v37 = vpop.f32.mrf.mxu0 }
 0x14a   : > { %1335 = vmatpush.msra.mxu2 %v594_v38  ;;  %1313 = vmatpush.msra.mxu1 %v482_v39  ;;  %v298_v4 = vld [vmem:[%s2015_s6 + $0xf0] sm:$0xff]  ;;  %v763_v32 = vld [vmem:[%s2015_s6 + $0xf78] sm:$0xff] }
 0x14b   : > { %1354 = vmatpush.msra.mxu3 %v730_v40  ;;  %1295 = vmatpush.msra.mxu0 %v338_v41  ;;  %v546_v5 = vld [vmem:[%s2015_s6 + $0x8b0] sm:$0xff]  ;;  %v371_v33 = vld [vmem:[%s2015_s6 + $0x338] sm:$0xff] }
 0x14c   : > { %1336 = vmatpush.msra.mxu2 %v586_v42  ;;  %1314 = vmatpush.msra.mxu1 %v474_v43  ;;  %v434_v6 = vld [vmem:[%s2015_s6 + $0x530] sm:$0xff]  ;;  %v507_v34 = vld [vmem:[%s2015_s6 + $0x778] sm:$0xff] }
 0x14d   : > { %1355 = vmatpush.msra.mxu3 %v722_v44  ;;  %1296 = vmatpush.msra.mxu0 %v330_v46  ;;  %v682_v7 = vld [vmem:[%s2015_s6 + $0xcf0] sm:$0xff]  ;;  %v619_v35 = vld [vmem:[%s2015_s6 + $0xaf8] sm:$0xff] }
 0x14e   : > { %1337 = vmatpush.msra.mxu2 %v578_v47  ;;  %1315 = vmatpush.msra.mxu1 %v466_v48  ;;  %v290_v9 = vld [vmem:[%s2015_s6 + $0xb0] sm:$0xff]  ;;  %v755_v36 = vld [vmem:[%s2015_s6 + $0xf38] sm:$0xff]  ;;  %v2544_v47 = vld [vmem:[%s233_s22] sm:$0xff]  ;;  %v925_v48 = vpop.f32.mrf.mxu1 }
 0x14f   : > { %1356 = vmatpush.msra.mxu3 %v714_v49  ;;  %1297 = vmatpush.msra.mxu0 %v322_v52  ;;  %v538_v10 = vld [vmem:[%s2015_s6 + $0x870] sm:$0xff]  ;;  %v363_v38 = vld [vmem:[%s2015_s6 + $0x2f8] sm:$0xff]  ;;  %v2546_v49 = vpop.f32.mrf.mxu2 }
 0x150   : > { %1338 = vmatpush.msra.mxu2 %v570_v53  ;;  %1316 = vmatpush.msra.mxu1 %v458_v54  ;;  %v426_v11 = vld [vmem:[%s2015_s6 + $0x4f0] sm:$0xff]  ;;  %v499_v39 = vld [vmem:[%s2015_s6 + $0x738] sm:$0xff] }
 0x151   : > { %1357 = vmatpush.msra.mxu3 %v706_v55  ;;  %1298 = vmatpush.msra.mxu0 %v314_v57  ;;  %v674_v12 = vld [vmem:[%s2015_s6 + $0xcb0] sm:$0xff]  ;;  %v611_v40 = vld [vmem:[%s2015_s6 + $0xab8] sm:$0xff] }
 0x152   : > { %1339 = vmatpush.msra.mxu2 %v562_v58  ;;  %1317 = vmatpush.msra.mxu1 %v450_v59  ;;  %v282_v13 = vld [vmem:[%s2015_s6 + $0x70] sm:$0xff]  ;;  %v747_v41 = vld [vmem:[%s2015_s6 + $0xef8] sm:$0xff]  ;;  %v783_v59 = vperm.slane %v2544_v47, 1 }
 0x153   : > { %1358 = vmatpush.msra.mxu3 %v698_v60  ;;  %1299 = vmatpush.msra.mxu0 %v306_v62  ;;  %v530_v14 = vld [vmem:[%s2015_s6 + $0x830] sm:$0xff]  ;;  %v355_v42 = vld [vmem:[%s2015_s6 + $0x2b8] sm:$0xff]  ;;  %v2555_v60 = vpop.f32.mrf.mxu3 }
 0x154   : > { %1340 = vmatpush.msra.mxu2 %v554_v63  ;;  %1318 = vmatpush.msra.mxu1 %v442_v0  ;;  %v418_v15 = vld [vmem:[%s2015_s6 + $0x4b0] sm:$0xff]  ;;  %v491_v43 = vld [vmem:[%s2015_s6 + $0x6f8] sm:$0xff]  ;;  %v784_v0 = vperm.slane %v2544_v47, 2 }
 0x155   : > { %1359 = vmatpush.msra.mxu3 %v690_v2  ;;  %1300 = vmatpush.msra.mxu0 %v298_v4  ;;  %v666_v16 = vld [vmem:[%s2015_s6 + $0xc70] sm:$0xff]  ;;  %v603_v44 = vld [vmem:[%s2015_s6 + $0xa78] sm:$0xff] }
 0x156   : > { %1341 = vmatpush.msra.mxu2 %v546_v5  ;;  %1319 = vmatpush.msra.mxu1 %v434_v6  ;;  %v274_v18 = vld [vmem:[%s2015_s6 + $0x30] sm:$0xff]  ;;  %v739_v46 = vld [vmem:[%s2015_s6 + $0xeb8] sm:$0xff] }
 0x157   : > { %1360 = vmatpush.msra.mxu3 %v682_v7  ;;  %1301 = vmatpush.msra.mxu0 %v290_v9  ;;  %v410_v19 = vld [vmem:[%s2015_s6 + $0x470] sm:$0xff]  ;;  %v347_v52 = vld [vmem:[%s2015_s6 + $0x278] sm:$0xff] }
 0x158   : > { %1342 = vmatpush.msra.mxu2 %v538_v10  ;;  %1320 = vmatpush.msra.mxu1 %v426_v11  ;;  %v658_v20 = vld [vmem:[%s2015_s6 + $0xc30] sm:$0xff]  ;;  %v483_v53 = vld [vmem:[%s2015_s6 + $0x6b8] sm:$0xff]  ;;  %v906_v11 = vadd.f32 %v905_v37, %v783_v59 }
 0x159   : > { %1361 = vmatpush.msra.mxu3 %v674_v12  ;;  %1302 = vmatpush.msra.mxu0 %v282_v13  ;;  %v402_v22 = vld [vmem:[%s2015_s6 + $0x430] sm:$0xff]  ;;  %v595_v54 = vld [vmem:[%s2015_s6 + $0xa38] sm:$0xff] }
 0x15a   : > { %1343 = vmatpush.msra.mxu2 %v530_v14  ;;  %1321 = vmatpush.msra.mxu1 %v418_v15  ;;  %v731_v55 = vld [vmem:[%s2015_s6 + $0xe78] sm:$0xff] }
 0x15b   : > { %1362 = vmatpush.msra.mxu3 %v666_v16  ;;  %1303 = vmatpush.msra.mxu0 %v274_v18  ;;  %v339_v57 = vld [vmem:[%s2015_s6 + $0x238] sm:$0xff] }
 0x15c   : > { %1408 = vmatpush.msrb.mxu2 %v651_v45  ;;  %1322 = vmatpush.msra.mxu1 %v410_v19  ;;  %v475_v58 = vld [vmem:[%s2015_s6 + $0x678] sm:$0xff]  ;;  %v782_v19 = vperm.slane %v2544_v47, 0 }
 0x15d   : > { %1363 = vmatpush.msra.mxu3 %v658_v20  ;;  %1368 = vmatpush.msrb.mxu0 %v395_v50  ;;  %v587_v62 = vld [vmem:[%s2015_s6 + $0x9f8] sm:$0xff] }
 0x15e   : > { %1409 = vmatpush.msrb.mxu2 %v643_v51  ;;  %1323 = vmatpush.msra.mxu1 %v402_v22  ;;  %v723_v63 = vld [vmem:[%s2015_s6 + $0xe38] sm:$0xff] }
 0x15f   : > { %1428 = vmatpush.msrb.mxu3 %v779_v21  ;;  %1369 = vmatpush.msrb.mxu0 %v387_v25  ;;  %v331_v2 = vld [vmem:[%s2015_s6 + $0x1f8] sm:$0xff]  ;;  %v926_v21 = vadd.f32 %v925_v48, %v906_v11 }
 0x160   : > { %1388 = vmatpush.msrb.mxu1 %v523_v56  ;;  %1410 = vmatpush.msrb.mxu2 %v635_v26  ;;  %v467_v4 = vld [vmem:[%s2015_s6 + $0x638] sm:$0xff] }
 0x161   : > { %1429 = vmatpush.msrb.mxu3 %v771_v27  ;;  %1370 = vmatpush.msrb.mxu0 %v379_v28  ;;  %v579_v6 = vld [vmem:[%s2015_s6 + $0x9b8] sm:$0xff]  ;;  %v785_v27 = vperm.slane %v2544_v47, 3 }
 0x162   : > { %1389 = vmatpush.msrb.mxu1 %v515_v29  ;;  %1411 = vmatpush.msrb.mxu2 %v627_v31  ;;  %v715_v7 = vld [vmem:[%s2015_s6 + $0xdf8] sm:$0xff]  ;;  %v826_v29 = vadd.f32 %v2506_v17, %v782_v19 }
 0x163   : > { %1430 = vmatpush.msrb.mxu3 %v763_v32  ;;  %1371 = vmatpush.msrb.mxu0 %v371_v33  ;;  %v323_v9 = vld [vmem:[%s2015_s6 + $0x1b8] sm:$0xff] }
 0x164   : > { %1390 = vmatpush.msrb.mxu1 %v507_v34  ;;  %1412 = vmatpush.msrb.mxu2 %v619_v35  ;;  %v459_v10 = vld [vmem:[%s2015_s6 + $0x5f8] sm:$0xff]  ;;  %v946_v35 = vadd.f32 %v2546_v49, %v926_v21 }
 0x165   : > { %1431 = vmatpush.msrb.mxu3 %v755_v36  ;;  %1372 = vmatpush.msrb.mxu0 %v363_v38  ;;  %v571_v12 = vld [vmem:[%s2015_s6 + $0x978] sm:$0xff] }
 0x166   : > { %1391 = vmatpush.msrb.mxu1 %v499_v39  ;;  %1413 = vmatpush.msrb.mxu2 %v611_v40  ;;  %v707_v13 = vld [vmem:[%s2015_s6 + $0xdb8] sm:$0xff]  ;;  %v846_v40 = vadd.f32 %v2516_v23, %v826_v29  ;;  %v966_v49 = vadd.f32 %v2555_v60, %v946_v35 }
 0x167   : > { %1432 = vmatpush.msrb.mxu3 %v747_v41  ;;  %1373 = vmatpush.msrb.mxu0 %v355_v42  ;;  %v315_v15 = vld [vmem:[%s2015_s6 + $0x178] sm:$0xff] }
 0x168   : > { %1392 = vmatpush.msrb.mxu1 %v491_v43  ;;  %1414 = vmatpush.msrb.mxu2 %v603_v44  ;;  %v451_v16 = vld [vmem:[%s2015_s6 + $0x5b8] sm:$0xff]  ;;  %v1456_v60 = vrot.slane %v966_v49, 6 }
 0x169   : > { %1433 = vmatpush.msrb.mxu3 %v739_v46  ;;  %1374 = vmatpush.msrb.mxu0 %v347_v52  ;;  %v563_v20 = vld [vmem:[%s2015_s6 + $0x938] sm:$0xff] }
 0x16a   : > { %1393 = vmatpush.msrb.mxu1 %v483_v53  ;;  %1415 = vmatpush.msrb.mxu2 %v595_v54  ;;  %v699_v50 = vld [vmem:[%s2015_s6 + $0xd78] sm:$0xff] }
 0x16b   : > { %1434 = vmatpush.msrb.mxu3 %v731_v55  ;;  %v985_v5 = vpop.f32.mrf.mxu0  ;;  %1375 = vmatpush.msrb.mxu0 %v339_v57  ;;  %v307_v51 = vld [vmem:[%s2015_s6 + $0x138] sm:$0xff]  ;;  %v866_v57 = vadd.f32 %v2518_v24, %v846_v40 }
 0x16c   : > { %1394 = vmatpush.msrb.mxu1 %v475_v58  ;;  %1416 = vmatpush.msrb.mxu2 %v587_v62  ;;  %v986_v14 = vadd.f32 %v985_v5, %v784_v0  ;;  %v443_v22 = vld [vmem:[%s2015_s6 + $0x578] sm:$0xff] }
 0x16d   : > { %1435 = vmatpush.msrb.mxu3 %v723_v63  ;;  %1376 = vmatpush.msrb.mxu0 %v331_v2  ;;  %v555_v25 = vld [vmem:[%s2015_s6 + $0x8f8] sm:$0xff]  ;;  %v886_v24 = vadd.f32 %v2526_v30, %v866_v57 }
 0x16e   : > { %1395 = vmatpush.msrb.mxu1 %v467_v4  ;;  %1417 = vmatpush.msrb.mxu2 %v579_v6  ;;  %v1005_v45 = vpop.f32.mrf.mxu1  ;;  %v1025_v18 = vpop.f32.mrf.mxu2  ;;  %v691_v28 = vld [vmem:[%s2015_s6 + $0xd38] sm:$0xff] }
 0x16f   : > { %1436 = vmatpush.msrb.mxu3 %v715_v7  ;;  %1377 = vmatpush.msrb.mxu0 %v323_v9  ;;  %v1006_v56 = vadd.f32 %v1005_v45, %v986_v14  ;;  %v299_v31 = vld [vmem:[%s2015_s6 + $0xf8] sm:$0xff]  ;;  %v786_v45 = vperm.slane %v2544_v47, 4 }
 0x170   : > { %1396 = vmatpush.msrb.mxu1 %v459_v10  ;;  %1418 = vmatpush.msrb.mxu2 %v571_v12  ;;  %v435_v32 = vld [vmem:[%s2015_s6 + $0x538] sm:$0xff] }
 0x171   : > { %1437 = vmatpush.msrb.mxu3 %v707_v13  ;;  %1378 = vmatpush.msrb.mxu0 %v315_v15  ;;  %v1045_v26 = vpop.f32.mrf.mxu3  ;;  %v547_v33 = vld [vmem:[%s2015_s6 + $0x8b8] sm:$0xff]  ;;  %v1026_v36 = vadd.f32 %v1025_v18, %v1006_v56  ;;  %v787_v13 = vperm.slane %v2544_v47, 5 }
 0x172   : > { %1397 = vmatpush.msrb.mxu1 %v451_v16  ;;  %1419 = vmatpush.msrb.mxu2 %v563_v20  ;;  %v683_v17 = vld [vmem:[%s2015_s6 + $0xcf8] sm:$0xff] }
 0x173   : > { %1438 = vmatpush.msrb.mxu3 %v699_v50  ;;  %1344 = vmatmul.f32.vlgmr.msra.gmra.mxu2 %v2414_v61  ;;  %v291_v38 = vld [vmem:[%s2015_s6 + $0xb8] sm:$0xff]  ;;  %v1046_v53 = vadd.f32 %v1045_v26, %v1026_v36 }
 0x174   : > { %1379 = vmatpush.msrb.mxu0 %v307_v51  ;;  %1398 = vmatpush.msrb.mxu1 %v443_v22  ;;  %v427_v39 = vld [vmem:[%s2015_s6 + $0x4f8] sm:$0xff] }
 0x175   : > { %1420 = vmatpush.msrb.mxu2 %v555_v25  ;;  %v1065_v34 = vpop.f32.mrf.mxu0  ;;  %1439 = vmatpush.msrb.mxu3 %v691_v28  ;;  %v539_v41 = vld [vmem:[%s2015_s6 + $0x878] sm:$0xff]  ;;  %v1457_v0 = vrot.slane %v1046_v53, 4  ;;  %v789_v25 = vperm.slane %v2544_v47, 7 }
 0x176   : > { %1304 = vmatmul.f32.vlgmr.msra.gmra.mxu0 %v2420_v1  ;;  %v1066_v37 = vadd.f32 %v1065_v34, %v785_v27  ;;  %1364 = vmatmul.f32.vlgmr.msra.gmra.mxu3 %v2424_v3  ;;  %v675_v42 = vld [vmem:[%s2015_s6 + $0xcb8] sm:$0xff] }
 0x177   : > { %1380 = vmatpush.msrb.mxu0 %v299_v31  ;;  %1399 = vmatpush.msrb.mxu1 %v435_v32  ;;  %v283_v43 = vld [vmem:[%s2015_s6 + $0x78] sm:$0xff] }
 0x178   : > { %1421 = vmatpush.msrb.mxu2 %v547_v33  ;;  %1440 = vmatpush.msrb.mxu3 %v683_v17  ;;  %v419_v44 = vld [vmem:[%s2015_s6 + $0x4b8] sm:$0xff]  ;;  %v1085_v46 = vpop.f32.mrf.mxu1  ;;  %v1105_v48 = vpop.f32.mrf.mxu2 }
 0x179   : > { %1324 = vmatmul.f32.vlgmr.msra.gmra.mxu1 %v2431_v8  ;;  %1381 = vmatpush.msrb.mxu0 %v291_v38  ;;  %v531_v52 = vld [vmem:[%s2015_s6 + $0x838] sm:$0xff]  ;;  %v1086_v54 = vadd.f32 %v1085_v46, %v1066_v37 }
 0x17a   : > { %1400 = vmatpush.msrb.mxu1 %v427_v39  ;;  %v667_v23 = vld [vmem:[%s2015_s6 + $0xc78] sm:$0xff]  ;;  %1422 = vmatpush.msrb.mxu2 %v539_v41 }
 0x17b   : > { %1441 = vmatpush.msrb.mxu3 %v675_v42  ;;  %v275_v55 = vld [vmem:[%s2015_s6 + $0x38] sm:$0xff]  ;;  %1382 = vmatpush.msrb.mxu0 %v283_v43  ;;  %v1106_v62 = vadd.f32 %v1105_v48, %v1086_v54  ;;  %v1125_v63 = vpop.f32.mrf.mxu3 }
 0x17c   : > { %1401 = vmatpush.msrb.mxu1 %v419_v44  ;;  %v411_v58 = vld [vmem:[%s2015_s6 + $0x478] sm:$0xff]  ;;  %1423 = vmatpush.msrb.mxu2 %v531_v52 }
 0x17d   : > { %v659_v59 = vld [vmem:[%s2015_s6 + $0xc38] sm:$0xff]  ;;  %1442 = vmatpush.msrb.mxu3 %v667_v23  ;;  %1424 = vmatmul.f32.vlgmr.msrb.gmra.mxu2 %v2414_v61  ;;  %v1126_v4 = vadd.f32 %v1125_v63, %v1106_v62  ;;  %v1463_v61 = vsel %vm1462_vm0, %v886_v24, %v1456_v60 }
 0x17e   : > { %1383 = vmatpush.msrb.mxu0 %v275_v55  ;;  %v403_v2 = vld [vmem:[%s2015_s6 + $0x438] sm:$0xff]  ;;  %1402 = vmatpush.msrb.mxu1 %v411_v58 }
 0x17f   : > { %1443 = vmatpush.msrb.mxu3 %v659_v59  ;;  %1384 = vmatmul.f32.vlgmr.msrb.gmra.mxu0 %v2420_v1  ;;  %v1458_v5 = vrot.slane %v1126_v4, 2 }
 0x180   : > { %1444 = vmatmul.f32.vlgmr.msrb.gmra.mxu3 %v2424_v3  ;;  %1403 = vmatpush.msrb.mxu1 %v403_v2 }
 0x181   : > { %1404 = vmatmul.f32.vlgmr.msrb.gmra.mxu1 %v2431_v8  ;;  %v1465_v6 = vsel %vm1464_vm1, %v1457_v0, %v1458_v5  ;;  %v788_v8 = vperm.slane %v2544_v47, 6 }
 0x182   : > { %v1467_v7 = vsel %vm1466_vm2, %v1463_v61, %v1465_v6 }
 0x183   : > { %1473 = vst [vmem:[%s2612_s25] sm:$0xff] %v1467_v7 }
 0x1af   : > { %v1145_v30 = vpop.f32.mrf.mxu0 }
 0x1b0   : > { %v1146_v51 = vadd.f32 %v1145_v30, %v786_v45 }
 0x1b2   : > { %v1165_v9 = vpop.f32.mrf.mxu1  ;;  %v1185_v1 = vpop.f32.mrf.mxu2 }
 0x1b3   : > { %v1166_v27 = vadd.f32 %v1165_v9, %v1146_v51 }
 0x1b5   : > { %v1205_v10 = vpop.f32.mrf.mxu3  ;;  %v1186_v35 = vadd.f32 %v1185_v1, %v1166_v27 }
 0x1b7   : > { %v1206_v39 = vadd.f32 %v1205_v10, %v1186_v35 }
 0x1b9   : > { %v1225_v3 = vpop.f32.mrf.mxu0 }
 0x1ba   : > { %v1226_v16 = vadd.f32 %v1225_v3, %v787_v13 }
 0x1bc   : > { %v1245_v11 = vpop.f32.mrf.mxu1  ;;  %v1265_v12 = vpop.f32.mrf.mxu2 }
 0x1bd   : > { %v1246_v50 = vadd.f32 %v1245_v11, %v1226_v16 }
 0x1bf   : > { %v1285_v14 = vpop.f32.mrf.mxu3  ;;  %v1266_v56 = vadd.f32 %v1265_v12, %v1246_v50 }
 0x1c1   : > { %v1286_v32 = vadd.f32 %v1285_v14, %v1266_v56 }
 0x1c3   : > { %v1459_v37 = vrot.slane %v1286_v32, 6 }
 0x1c5   : > { %v1468_v42 = vsel %vm1462_vm0, %v1206_v39, %v1459_v37 }
 0x1f3   : > { %v1305_v15 = vpop.f32.mrf.mxu0 }
 0x1f4   : > { %v1306_v18 = vadd.f32 %v1305_v15, %v788_v8 }
 0x1f6   : > { %v1325_v19 = vpop.f32.mrf.mxu1  ;;  %v1345_v20 = vpop.f32.mrf.mxu2 }
 0x1f7   : > { %v1326_v21 = vadd.f32 %v1325_v19, %v1306_v18 }
 0x1f9   : > { %v1365_v22 = vpop.f32.mrf.mxu3  ;;  %v1346_v28 = vadd.f32 %v1345_v20, %v1326_v21 }
 0x1fb   : > { %v1366_v17 = vadd.f32 %v1365_v22, %v1346_v28 }
 0x1fc   : > { %v1385_v26 = vpop.f32.mrf.mxu0 }
 0x1fd   : > { %v1386_v29 = vadd.f32 %v1385_v26, %v789_v25  ;;  %v1460_v40 = vrot.slane %v1366_v17, 4 }
 0x1fe   : > { %v1405_v31 = vpop.f32.mrf.mxu1 }
 0x1ff   : > { %v1406_v33 = vadd.f32 %v1405_v31, %v1386_v29 }
 0x200   : > { %v1425_v34 = vpop.f32.mrf.mxu2 }
 0x201   : > { %v1426_v36 = vadd.f32 %v1425_v34, %v1406_v33 }
 0x203   : > { %v1445_v47 = vpop.f32.mrf.mxu3 }
 0x204   : > { %v1446_v38 = vadd.f32 %v1445_v47, %v1426_v36 }
 0x206   : > { %v1461_v41 = vrot.slane %v1446_v38, 2 }
 0x208   : > { %v1469_v43 = vsel %vm1464_vm1, %v1460_v40, %v1461_v41 }
 0x209   : > { %v1470_v44 = vsel %vm1466_vm2, %v1468_v42, %v1469_v43 }
 0x20a   : > { %1474 = vst [vmem:[%s2612_s25 + $0x8] sm:$0xff] %v1470_v44 }
 0x20b   : > { %1808 = shalt.err (!%p1805_p5)
}
 0x20c   : > { %1635 = dma.vmem_to_hbm [thread:$0]  (%p1921_p11), %s1490_s7, 256, %s1492_s1, %s1476_s16  }
 0x20d PF: > { %s1503_s21 = sand.u32 1, %s1839_s12   ;;  %p1648_p7 = pnand %p1607_p9, %p1925_p12 }
 0x20e   : > { %s1504_s14 = scalar_lea.sflag [#allocation4], %s1503_s21 }
 0x20f   : > { %p1649_p8 = pneg %p1648_p7 }
 0x211   : > { %1834 = dma.done.wait (%p1649_p8), %s1504_s14, 256  }
 0x212   : > { %1836 = vsyncadd (%p1649_p8), %s1504_s14, 4294967040  ;;  %s2671_s26 = sld [smem:[#allocation12_spill]]  ;;  %p19_p10 = scmp.ge.s32.totalorder %s1900_s18, 4  }
 0x213   : > { %s2672_s14 = sld [smem:[#allocation13_spill]]  ;;  %s2673_s12 = smov %s1843_s13 }
 0x214   : > { %s2675_s15 = smov %s1900_s18  ;;  %21 = sbr.rel (!%p19_p10) target bundleno = 9 (0x9), region = 101 }
 0x218   : > { %s2674_s13 = smov %s2671_s26 }
 0x219   :  { %1510 = vsyncpa [#allocation3], 1 }
 0x21a   :  { %1512 = vsyncpa [#allocation3 + $0x1], 1 }
 0x21b   :  { %1513 = vsyncpa [#allocation6], 1 }
 0x21c   :  { %1515 = vsyncpa [#allocation6 + $0x1], 1 }
 0x21d   :  { %1516 = vsyncpa [#allocation4], 1 }
 0x21e   :  { %1518 = vsyncpa [#allocation4 + $0x1], 1 }

</bundles_post_ra>
